<compile_context>
chip_gen: v7x
topology: tpu7x:2x2x1
jax: 0.10.0
libtpu: 0.0.40
codegen_flags: <defaults>
</compile_context>

<pallas_src>
import functools

import jax
import jax.numpy as jnp
import numpy as np
from jax.experimental import pallas as pl
from jax.experimental.pallas import tpu as pltpu


def ex2vec_kernel(params_ref,                       # SMEM (5,)
                  uemb_ref,                         # VMEM (TB, D, 1)
                  iemb_ref,                         # VMEM (TB, D, I)
                  ibias_ref,                        # VMEM (TB, I)
                  ulamb_ref,                        # VMEM (TB, 1)
                  ubias_ref,                        # VMEM (TB, 1)
                  td_ref,                           # VMEM (TB, T, I)
                  w_ref,                            # VMEM (TB, T, I)
                  out_ref):                         # VMEM (TB, I)
    alpha       = params_ref[0]
    beta        = params_ref[1]
    gamma       = params_ref[2]
    cutoff      = params_ref[3]
    global_lamb = params_ref[4]

    # base_dist = ||user_emb - item_emb|| reduced over D (sublane axis)
    # -> result (TB, I) is already lane-dense (no relayout before the store).
    diff = uemb_ref[...] - iemb_ref[...]                       # (TB, D, I)
    base_dist = jnp.sqrt(jnp.sum(diff * diff, axis=1))         # (TB, I)

    # timedeltas = clamp(td + cutoff, min=1e-6) ** -0.5, then * weights twice.
    # rsqrt lowers to a single EUP op (own VLIW slot) instead of sqrt + divide.
    w = w_ref[...]                                             # (TB, T, I)
    t = jax.lax.rsqrt(jnp.maximum(td_ref[...] + cutoff, 1e-6))
    t = t * w
    t = t * w

    # lamb = global_lamb + user_lamb(user_id): built once per block as (TB, 1),
    # broadcast over I is a cheap lane broadcast.
    lamb = global_lamb + ulamb_ref[...]                        # (TB, 1)
    base_level = lamb * jnp.sum(t, axis=1)                     # (TB, I), T reduced on sublanes

    out = jnp.maximum(base_dist - base_level, 0.0)             # (TB, I)
    out_ref[...] = (alpha * out + beta * (out * out) + gamma
                    + ubias_ref[...] + ibias_ref[...])


def _choose_tb(B, I, D, T, budget_bytes=12 * 1024 * 1024):
    """Pick batch rows per grid step from a double-buffered VMEM budget."""
    # f32 bytes, double-buffered inputs + output, per batch row.
    per_row = 8 * (D            # user_emb   (D, 1)
                   + D * I      # item_emb   (D, I)
                   + I          # item_bias  (I,)
                   + 2          # user_lamb + user_bias
                   + 2 * T * I  # timedeltas + weights (T, I)
                   + I)         # output     (I,)
    tb = max(1, budget_bytes // per_row)
    if tb >= B:
        return B                       # single block covers the whole batch
    return max(8, (tb // 8) * 8)       # multiple of 8 for sublane alignment


@jax.jit
def ex2vec_forward(params, user_lamb_v, user_bias_v,
                   user_emb, item_emb, item_bias_v, timedeltas, weights):
    B, I, D = item_emb.shape
    T = timedeltas.shape[-1]

    # Wrapper-side layout plumbing: put I on the lane axis for every per-item tensor.
    uemb_t = user_emb.reshape(B, D, 1).astype(jnp.float32)
    iemb_t = jnp.transpose(item_emb, (0, 2, 1)).astype(jnp.float32)      # (B, D, I)
    td_t   = jnp.transpose(timedeltas, (0, 2, 1)).astype(jnp.float32)    # (B, T, I)
    w_t    = jnp.transpose(weights, (0, 2, 1)).astype(jnp.float32)       # (B, T, I)
    ulamb  = user_lamb_v.reshape(B, 1).astype(jnp.float32)
    ubias  = user_bias_v.reshape(B, 1).astype(jnp.float32)
    ibias  = item_bias_v.astype(jnp.float32)                             # (B, I)

    TB = _choose_tb(B, I, D, T)
    B_pad = ((B + TB - 1) // TB) * TB
    if B_pad != B:
        pad = B_pad - B
        pad3 = lambda x: jnp.pad(x, ((0, pad), (0, 0), (0, 0)))
        pad2 = lambda x: jnp.pad(x, ((0, pad), (0, 0)))
        uemb_t, iemb_t, td_t, w_t = pad3(uemb_t), pad3(iemb_t), pad3(td_t), pad3(w_t)
        ulamb, ubias, ibias = pad2(ulamb), pad2(ubias), pad2(ibias)

    smem_spec = pl.BlockSpec(memory_space=pltpu.MemorySpace.SMEM)

    out = pl.pallas_call(
        ex2vec_kernel,
        out_shape=jax.ShapeDtypeStruct((B_pad, I), jnp.float32),
        grid=(B_pad // TB,),
        in_specs=[
            smem_spec,                                            # params (5,)
            pl.BlockSpec((TB, D, 1), lambda b: (b, 0, 0)),        # user_emb
            pl.BlockSpec((TB, D, I), lambda b: (b, 0, 0)),        # item_emb
            pl.BlockSpec((TB, I),    lambda b: (b, 0)),           # item_bias
            pl.BlockSpec((TB, 1),    lambda b: (b, 0)),           # user_lamb
            pl.BlockSpec((TB, 1),    lambda b: (b, 0)),           # user_bias
            pl.BlockSpec((TB, T, I), lambda b: (b, 0, 0)),        # timedeltas
            pl.BlockSpec((TB, T, I), lambda b: (b, 0, 0)),        # weights
        ],
        out_specs=pl.BlockSpec((TB, I), lambda b: (b, 0)),
        compiler_params=pltpu.CompilerParams(
            dimension_semantics=("parallel",),        # batch blocks are independent
            vmem_limit_bytes=32 * 1024 * 1024,
        ),
    )(params, uemb_t, iemb_t, ibias, ulamb, ubias, td_t, w_t)

    return out[:B]


def reference_forward(params, user_lamb_v, user_bias_v,
                      user_emb, item_emb, item_bias_v, timedeltas, weights):
    """Pure-JAX mirror of the PyTorch forward (post-gather)."""
    alpha, beta, gamma, cutoff, global_lamb = [params[i] for i in range(5)]
    base_dist = jnp.linalg.norm(user_emb[:, None, :] - item_emb, axis=-1)   # (B, I)
    lamb = global_lamb + user_lamb_v                                        # (B,)
    t = jnp.power(jnp.maximum(timedeltas + cutoff, 1e-6), -0.5)
    t = t * weights
    t = t * weights
    base_level = lamb[:, None] * jnp.sum(t, axis=2)                         # (B, I)
    out = jnp.maximum(jnp.zeros_like(base_dist), base_dist - base_level)
    return (alpha * out + beta * out ** 2 + gamma
            + user_bias_v[:, None] + item_bias_v)


if __name__ == "__main__":
    # Config (mirrors module __init__)
    n_users, n_items, latent_d = 10, 12, 32
    B, I, T = 16, 8, 8          # batch, items per row, history length

    key = jax.random.PRNGKey(0)
    keys = jax.random.split(key, 10)

    # Parameters (Embedding ~ N(0,1), matches torch init semantics)
    embedding_user = jax.random.normal(keys[0], (n_users + 1, latent_d), jnp.float32)
    embedding_item = jax.random.normal(keys[1], (n_items + 1, latent_d), jnp.float32)
    user_lamb_tbl  = jax.random.normal(keys[2], (n_users + 1, 1), jnp.float32)
    user_bias_tbl  = jax.random.normal(keys[3], (n_users + 1, 1), jnp.float32)
    item_bias_tbl  = jax.random.normal(keys[4], (n_items + 1, 1), jnp.float32)

    alpha, beta, gamma, cutoff, global_lamb = 1.0, -0.065, 0.5, 3.0, 1.0
    params = jnp.array([alpha, beta, gamma, cutoff, global_lamb], jnp.float32)

    # Inputs
    user_id    = jax.random.randint(keys[5], (B,), 0, n_users + 1)
    item_id    = jax.random.randint(keys[6], (B, I), 0, n_items + 1)
    timedeltas = jax.random.uniform(keys[7], (B, I, T), jnp.float32, 0.0, 10.0)
    weights    = jax.random.uniform(keys[8], (B, I, T), jnp.float32, 0.0, 1.0)

    # Embedding gathers (plain-JAX glue, equivalent to torch.nn.Embedding lookups)
    # TODO(synk): gathers stay in XLA; only the post-gather math is a Pallas kernel.
    user_emb   = embedding_user[user_id]          # (B, D)
    item_emb   = embedding_item[item_id]          # (B, I, D)
    user_lamb  = user_lamb_tbl[user_id, 0]        # (B,)
    user_bias  = user_bias_tbl[user_id, 0]        # (B,)
    item_bias  = item_bias_tbl[item_id, 0]        # (B, I)

    out = ex2vec_forward(params, user_lamb, user_bias,
                         user_emb, item_emb, item_bias, timedeltas, weights)
    out = jax.block_until_ready(out)

    ref = reference_forward(params, user_lamb, user_bias,
                            user_emb, item_emb, item_bias, timedeltas, weights)
    np.testing.assert_allclose(np.asarray(out), np.asarray(ref), rtol=1e-4, atol=1e-4)

    print("KERNEL_OK")
</pallas_src>

<mosaic_0001>
module attributes {stable_mosaic.version = 11 : i64} {
  func.func @ex2vec_kernel(%arg0: i32, %arg1: memref<5xf32, #tpu.memory_space<smem>>, %arg2: memref<16x32x1xf32, #tpu.memory_space<vmem>>, %arg3: memref<16x32x8xf32, #tpu.memory_space<vmem>>, %arg4: memref<16x8xf32, #tpu.memory_space<vmem>>, %arg5: memref<16x1xf32, #tpu.memory_space<vmem>>, %arg6: memref<16x1xf32, #tpu.memory_space<vmem>>, %arg7: memref<16x8x8xf32, #tpu.memory_space<vmem>>, %arg8: memref<16x8x8xf32, #tpu.memory_space<vmem>>, %arg9: memref<16x8xf32, #tpu.memory_space<vmem>>) attributes {dimension_semantics = [#tpu.dimension_semantics<parallel>], iteration_bounds = array<i64: 1>, scalar_prefetch = 0 : i64, scratch_operands = 0 : i64, tpu.core_type = #tpu.core_type<tc>, window_params = [{transform_indices = @transform_0, window_bounds = array<i64: 5>}, {transform_indices = @transform_1, window_bounds = array<i64: 16, 32, 1>}, {transform_indices = @transform_2, window_bounds = array<i64: 16, 32, 8>}, {transform_indices = @transform_3, window_bounds = array<i64: 16, 8>}, {transform_indices = @transform_4, window_bounds = array<i64: 16, 1>}, {transform_indices = @transform_5, window_bounds = array<i64: 16, 1>}, {transform_indices = @transform_6, window_bounds = array<i64: 16, 8, 8>}, {transform_indices = @transform_7, window_bounds = array<i64: 16, 8, 8>}, {transform_indices = @transform_8, window_bounds = array<i64: 16, 8>}]} {
    %c0 = arith.constant 0 : index
    %0 = memref.load %arg1[%c0] : memref<5xf32, #tpu.memory_space<smem>>
    %c1 = arith.constant 1 : index
    %1 = memref.load %arg1[%c1] : memref<5xf32, #tpu.memory_space<smem>>
    %c2 = arith.constant 2 : index
    %2 = memref.load %arg1[%c2] : memref<5xf32, #tpu.memory_space<smem>>
    %c3 = arith.constant 3 : index
    %3 = memref.load %arg1[%c3] : memref<5xf32, #tpu.memory_space<smem>>
    %c4 = arith.constant 4 : index
    %4 = memref.load %arg1[%c4] : memref<5xf32, #tpu.memory_space<smem>>
    %c0_0 = arith.constant 0 : index
    %c0_1 = arith.constant 0 : index
    %c0_2 = arith.constant 0 : index
    %5 = vector.load %arg2[%c0_0, %c0_1, %c0_2] : memref<16x32x1xf32, #tpu.memory_space<vmem>>, vector<16x32x1xf32>
    %c0_3 = arith.constant 0 : index
    %c0_4 = arith.constant 0 : index
    %c0_5 = arith.constant 0 : index
    %6 = vector.load %arg3[%c0_3, %c0_4, %c0_5] : memref<16x32x8xf32, #tpu.memory_space<vmem>>, vector<16x32x8xf32>
    %7 = vector.broadcast %5 : vector<16x32x1xf32> to vector<16x32x8xf32>
    %8 = arith.subf %7, %6 : vector<16x32x8xf32>
    %9 = arith.mulf %8, %8 : vector<16x32x8xf32>
    %cst = arith.constant dense<0.000000e+00> : vector<16x8xf32>
    %10 = vector.multi_reduction <add>, %9, %cst [1] : vector<16x32x8xf32> to vector<16x8xf32>
    %11 = math.sqrt %10 : vector<16x8xf32>
    %c0_6 = arith.constant 0 : index
    %c0_7 = arith.constant 0 : index
    %c0_8 = arith.constant 0 : index
    %12 = vector.load %arg8[%c0_6, %c0_7, %c0_8] : memref<16x8x8xf32, #tpu.memory_space<vmem>>, vector<16x8x8xf32>
    %c0_9 = arith.constant 0 : index
    %c0_10 = arith.constant 0 : index
    %c0_11 = arith.constant 0 : index
    %13 = vector.load %arg7[%c0_9, %c0_10, %c0_11] : memref<16x8x8xf32, #tpu.memory_space<vmem>>, vector<16x8x8xf32>
    %14 = vector.broadcast %3 : f32 to vector<16x8x8xf32>
    %15 = arith.addf %13, %14 : vector<16x8x8xf32>
    %cst_12 = arith.constant 9.99999997E-7 : f32
    %16 = vector.broadcast %cst_12 : f32 to vector<16x8x8xf32>
    %17 = arith.maximumf %15, %16 : vector<16x8x8xf32>
    %18 = math.rsqrt %17 : vector<16x8x8xf32>
    %19 = arith.mulf %18, %12 : vector<16x8x8xf32>
    %20 = arith.mulf %19, %12 : vector<16x8x8xf32>
    %c0_13 = arith.constant 0 : index
    %c0_14 = arith.constant 0 : index
    %21 = vector.load %arg5[%c0_13, %c0_14] : memref<16x1xf32, #tpu.memory_space<vmem>>, vector<16x1xf32>
    %22 = vector.broadcast %4 : f32 to vector<16x1xf32>
    %23 = arith.addf %22, %21 : vector<16x1xf32>
    %cst_15 = arith.constant dense<0.000000e+00> : vector<16x8xf32>
    %24 = vector.multi_reduction <add>, %20, %cst_15 [1] : vector<16x8x8xf32> to vector<16x8xf32>
    %25 = vector.broadcast %23 : vector<16x1xf32> to vector<16x8xf32>
    %26 = arith.mulf %25, %24 : vector<16x8xf32>
    %27 = arith.subf %11, %26 : vector<16x8xf32>
    %cst_16 = arith.constant 0.000000e+00 : f32
    %28 = vector.broadcast %cst_16 : f32 to vector<16x8xf32>
    %29 = arith.maximumf %27, %28 : vector<16x8xf32>
    %30 = vector.broadcast %0 : f32 to vector<16x8xf32>
    %31 = arith.mulf %30, %29 : vector<16x8xf32>
    %32 = arith.mulf %29, %29 : vector<16x8xf32>
    %33 = vector.broadcast %1 : f32 to vector<16x8xf32>
    %34 = arith.mulf %33, %32 : vector<16x8xf32>
    %35 = arith.addf %31, %34 : vector<16x8xf32>
    %36 = vector.broadcast %2 : f32 to vector<16x8xf32>
    %37 = arith.addf %35, %36 : vector<16x8xf32>
    %c0_17 = arith.constant 0 : index
    %c0_18 = arith.constant 0 : index
    %38 = vector.load %arg6[%c0_17, %c0_18] : memref<16x1xf32, #tpu.memory_space<vmem>>, vector<16x1xf32>
    %39 = vector.broadcast %38 : vector<16x1xf32> to vector<16x8xf32>
    %40 = arith.addf %37, %39 : vector<16x8xf32>
    %c0_19 = arith.constant 0 : index
    %c0_20 = arith.constant 0 : index
    %41 = vector.load %arg4[%c0_19, %c0_20] : memref<16x8xf32, #tpu.memory_space<vmem>>, vector<16x8xf32>
    %42 = arith.addf %40, %41 : vector<16x8xf32>
    %c0_21 = arith.constant 0 : index
    %c0_22 = arith.constant 0 : index
    %43 = vector.load %arg9[%c0_21, %c0_22] : memref<16x8xf32, #tpu.memory_space<vmem>>, vector<16x8xf32>
    tpu.vector_store %arg9[%c0_21, %c0_22], %42 {strides = array<i32>} : memref<16x8xf32, #tpu.memory_space<vmem>>, vector<16x8xf32>,
    return
  }
  func.func @transform_0(%arg0: i32) -> i32 {
    %c0_i32 = arith.constant 0 : i32
    %c0_i32_0 = arith.constant 0 : i32
    return %c0_i32 : i32
  }
  func.func @transform_1(%arg0: i32) -> (i32, i32, i32) {
    %c0_i32 = arith.constant 0 : i32
    %c0_i32_0 = arith.constant 0 : i32
    %c0_i32_1 = arith.constant 0 : i32
    return %arg0, %c0_i32, %c0_i32_0 : i32, i32, i32
  }
  func.func @transform_2(%arg0: i32) -> (i32, i32, i32) {
    %c0_i32 = arith.constant 0 : i32
    %c0_i32_0 = arith.constant 0 : i32
    %c0_i32_1 = arith.constant 0 : i32
    return %arg0, %c0_i32, %c0_i32_0 : i32, i32, i32
  }
  func.func @transform_3(%arg0: i32) -> (i32, i32) {
    %c0_i32 = arith.constant 0 : i32
    %c0_i32_0 = arith.constant 0 : i32
    return %arg0, %c0_i32 : i32, i32
  }
  func.func @transform_4(%arg0: i32) -> (i32, i32) {
    %c0_i32 = arith.constant 0 : i32
    %c0_i32_0 = arith.constant 0 : i32
    return %arg0, %c0_i32 : i32, i32
  }
  func.func @transform_5(%arg0: i32) -> (i32, i32) {
    %c0_i32 = arith.constant 0 : i32
    %c0_i32_0 = arith.constant 0 : i32
    return %arg0, %c0_i32 : i32, i32
  }
  func.func @transform_6(%arg0: i32) -> (i32, i32, i32) {
    %c0_i32 = arith.constant 0 : i32
    %c0_i32_0 = arith.constant 0 : i32
    %c0_i32_1 = arith.constant 0 : i32
    return %arg0, %c0_i32, %c0_i32_0 : i32, i32, i32
  }
  func.func @transform_7(%arg0: i32) -> (i32, i32, i32) {
    %c0_i32 = arith.constant 0 : i32
    %c0_i32_0 = arith.constant 0 : i32
    %c0_i32_1 = arith.constant 0 : i32
    return %arg0, %c0_i32, %c0_i32_0 : i32, i32, i32
  }
  func.func @transform_8(%arg0: i32) -> (i32, i32) {
    %c0_i32 = arith.constant 0 : i32
    %c0_i32_0 = arith.constant 0 : i32
    return %arg0, %c0_i32 : i32, i32
  }
}

</mosaic_0001>

<bundles_post_ra>
// kernel: ex2vec_forward.1
= control target key start
LH: loop header
LB: loop body
LE: loop exit
PB: predicated region body
PF: predicated region fallthrough
CT: control target
= control target key end

     0   :  { %13 = vsyncpa [#allocation3], 0  ;;  %s2785_s0 = inlined_call_operand.vmem [shape: f32[5], index: 0, kind: input, shape index: {}]   ;;  %s2786_s1 = inlined_call_operand.vmem [shape: f32[16,32,1], index: 1, kind: input, shape index: {}]   ;;  %s2787_s2 = inlined_call_operand.vmem [shape: f32[16,32,8], index: 2, kind: input, shape index: {}]   ;;  %s2788_s3 = inlined_call_operand.vmem [shape: f32[16,8], index: 3, kind: input, shape index: {}]   ;;  %s2789_s4 = inlined_call_operand.vmem [shape: f32[16,1], index: 4, kind: input, shape index: {}]   ;;  %s2790_s5 = inlined_call_operand.vmem [shape: f32[16,1], index: 5, kind: input, shape index: {}]   ;;  %s2791_s6 = inlined_call_operand.vmem [shape: f32[16,8,8], index: 6, kind: input, shape index: {}]   ;;  %s2792_s7 = inlined_call_operand.vmem [shape: f32[16,8,8], index: 7, kind: input, shape index: {}]   ;;  %s2793_s8 = inlined_call_operand.vmem [shape: f32[16,8], index: 8, kind: output, shape index: {}]  }
   0x1   :  { %s20_s29 = sshll.u32 %s2785_s0, 4  ;;  %s21_s29 = int_to_ptr.vmem [resolvable:$true] %s20_s29 }
   0x2   :  { %s1603_s30 = scalar_lea.vmem %s21_s29, 16  ;;  %p1608_p1 = scmp.lt.s32.totalorder %s21_s29, %s21_s29 }
   0x3   :  { %p1604_p0 = scmp.ne.s32.totalorder %s21_s29, %s1603_s30  ;;  %p1609_p2 = scmp.lt.s32.totalorder %s1603_s30, %s1603_s30 }
   0x5   :  { %p1610_p3 = por %p1609_p2, %p1608_p1 }
   0x7   :  { %p1611_p4 = pnand %p1610_p3, %p1604_p0 }
   0x9   :  { %1614 = shalt.err (!%p1611_p4)
}
   0xa   :  { %s1617_s9 = smov [#allocation2]  }
   0xb   :  { %23 = dma.vmem_to_smem %s21_s29, 16, %s1617_s9, [#allocation3]  }
   0xc   :  { %1615 = dma.done.wait [#allocation3], 16  }
   0xd   :  { %1616 = vsyncadd [#allocation3], 4294967280 }
   0xe   :  { %41 = sfence }
   0xf   :  { %v49_v0 = vld [vmem:[%s2786_s1 + $0x10] sm:$0xff]  ;;  %v47_v1 = vld [vmem:[%s2786_s1] sm:$0xff]  ;;  %v1618_v2 = vmov 0   ;;  %v50_v3 = vld [vmem:[%s2786_s1 + $0x18] sm:$0xff]  ;;  %s1533_s10 = sld [smem:[#allocation2 + $0x3]]  ;;  %s1869_s23 = sld [smem:[#allocation2 + $0x4]] }
  0x10   :  { %1538 = vset.pattern.permute.xlu1 %v1618_v2  ;;  %1537 = vset.pattern.permute.xlu0 %v1618_v2  ;;  %v48_v4 = vld [vmem:[%s2786_s1 + $0x8] sm:$0xff]  ;;  %v51_v6 = vld [vmem:[%s2786_s1 + $0x20] sm:$0xff]  ;;  %v54_v7 = vld [vmem:[%s2786_s1 + $0x38] sm:$0xff]  ;;  %vm623_vm0 = vcmask 64512   ;;  %vm1200_vm1 = vcmask 1041409   ;;  %vm1202_vm2 = vcmask 1042434  }
  0x11   :  { %187 = vperm.xlu1 %1538, %v49_v0   ;;  %177 = vperm.xlu0 %1537, %v47_v1   ;;  %v52_v5 = vld [vmem:[%s2786_s1 + $0x28] sm:$0xff]  ;;  %v53_v8 = vld [vmem:[%s2786_s1 + $0x30] sm:$0xff]  ;;  %v55_v10 = vld [vmem:[%s2786_s1 + $0x40] sm:$0xff]  ;;  %vm1204_vm3 = vcmask 1043459   ;;  %vm1206_vm4 = vcmask 1044484   ;;  %vm1208_vm5 = vcmask 1045509  }
  0x12   :  { %v56_v9 = vld [vmem:[%s2786_s1 + $0x48] sm:$0xff]  ;;  %v58_v11 = vld [vmem:[%s2786_s1 + $0x58] sm:$0xff]  ;;  %v57_v12 = vld [vmem:[%s2786_s1 + $0x50] sm:$0xff]  ;;  %vm1210_vm6 = vcmask 1046534   ;;  %vm2794_vm7 = vcmask 1047559   ;;  %s2318_s9 = sld [smem:[#allocation2]] }
  0x13   :  { %v60_v13 = vld [vmem:[%s2786_s1 + $0x68] sm:$0xff]  ;;  %v59_v14 = vld [vmem:[%s2786_s1 + $0x60] sm:$0xff]  ;;  %v62_v15 = vld [vmem:[%s2786_s1 + $0x78] sm:$0xff]  ;;  %s2324_s11 = sld [smem:[#allocation2 + $0x2]] }
  0x14   :  { %v61_v16 = vld [vmem:[%s2786_s1 + $0x70] sm:$0xff]  ;;  %v64_v17 = vld [vmem:[%s2786_s1 + $0x88] sm:$0xff]  ;;  %v63_v18 = vld [vmem:[%s2786_s1 + $0x80] sm:$0xff] }
  0x15   :  { %192 = vperm.xlu1 %1538, %v50_v3   ;;  %182 = vperm.xlu0 %1537, %v48_v4   ;;  %v66_v19 = vld [vmem:[%s2786_s1 + $0x98] sm:$0xff]  ;;  %v65_v20 = vld [vmem:[%s2786_s1 + $0x90] sm:$0xff]  ;;  %v68_v21 = vld [vmem:[%s2786_s1 + $0xa8] sm:$0xff]  ;;  %v1820_v52 = vstv %s1533_s10  ;;  %s2322_s10 = sld [smem:[#allocation2 + $0x1]] }
  0x16   :  { %v67_v22 = vld [vmem:[%s2786_s1 + $0xa0] sm:$0xff]  ;;  %v70_v23 = vld [vmem:[%s2786_s1 + $0xb8] sm:$0xff]  ;;  %v69_v24 = vld [vmem:[%s2786_s1 + $0xb0] sm:$0xff] }
  0x17   :  { %v72_v25 = vld [vmem:[%s2786_s1 + $0xc8] sm:$0xff]  ;;  %v71_v26 = vld [vmem:[%s2786_s1 + $0xc0] sm:$0xff]  ;;  %v74_v27 = vld [vmem:[%s2786_s1 + $0xd8] sm:$0xff] }
  0x18   :  { %v73_v28 = vld [vmem:[%s2786_s1 + $0xd0] sm:$0xff]  ;;  %v76_v29 = vld [vmem:[%s2786_s1 + $0xe8] sm:$0xff]  ;;  %v75_v30 = vld [vmem:[%s2786_s1 + $0xe0] sm:$0xff] }
  0x19   :  { %202 = vperm.xlu1 %1538, %v52_v5   ;;  %197 = vperm.xlu0 %1537, %v51_v6   ;;  %v78_v31 = vld [vmem:[%s2786_s1 + $0xf8] sm:$0xff]  ;;  %v77_v32 = vld [vmem:[%s2786_s1 + $0xf0] sm:$0xff]  ;;  %v80_v33 = vld [vmem:[%s2786_s1 + $0x108] sm:$0xff] }
  0x1a   :  { %v79_v34 = vld [vmem:[%s2786_s1 + $0x100] sm:$0xff]  ;;  %v82_v35 = vld [vmem:[%s2786_s1 + $0x118] sm:$0xff]  ;;  %v81_v36 = vld [vmem:[%s2786_s1 + $0x110] sm:$0xff] }
  0x1b   :  { %v84_v37 = vld [vmem:[%s2786_s1 + $0x128] sm:$0xff]  ;;  %v83_v38 = vld [vmem:[%s2786_s1 + $0x120] sm:$0xff]  ;;  %v85_v42 = vld [vmem:[%s2786_s1 + $0x130] sm:$0xff] }
  0x1c   :  { %v88_v39 = vld [vmem:[%s2786_s1 + $0x148] sm:$0xff]  ;;  %v87_v40 = vld [vmem:[%s2786_s1 + $0x140] sm:$0xff]  ;;  %v89_v43 = vld [vmem:[%s2786_s1 + $0x150] sm:$0xff] }
  0x1d   :  { %212 = vperm.xlu1 %1538, %v54_v7   ;;  %207 = vperm.xlu0 %1537, %v53_v8   ;;  %v91_v41 = vld [vmem:[%s2786_s1 + $0x160] sm:$0xff]  ;;  %v92_v44 = vld [vmem:[%s2786_s1 + $0x168] sm:$0xff]  ;;  %v93_v47 = vld [vmem:[%s2786_s1 + $0x170] sm:$0xff] }
  0x1e   :  { %v96_v45 = vld [vmem:[%s2786_s1 + $0x188] sm:$0xff]  ;;  %v95_v46 = vld [vmem:[%s2786_s1 + $0x180] sm:$0xff]  ;;  %v86_v48 = vld [vmem:[%s2786_s1 + $0x138] sm:$0xff] }
  0x1f   :  { %v100_v49 = vld [vmem:[%s2786_s1 + $0x1a8] sm:$0xff]  ;;  %v99_v50 = vld [vmem:[%s2786_s1 + $0x1a0] sm:$0xff]  ;;  %v970_v54 = vld [vmem:[%s2791_s6 + $0x50] sm:$0xff] }
  0x20   :  { %v968_v51 = vld [vmem:[%s2791_s6 + $0x40] sm:$0xff]  ;;  %v969_v53 = vld [vmem:[%s2791_s6 + $0x48] sm:$0xff]  ;;  %v971_v56 = vld [vmem:[%s2791_s6 + $0x58] sm:$0xff]  ;;  %v987_v58 = vadd.f32 %v1820_v52, %v970_v54 }
  0x21   :  { %222 = vperm.xlu1 %1538, %v56_v9   ;;  %217 = vperm.xlu0 %1537, %v55_v10   ;;  %v985_v55 = vadd.f32 %v1820_v52, %v968_v51  ;;  %v986_v57 = vadd.f32 %v1820_v52, %v969_v53  ;;  %v972_v59 = vld [vmem:[%s2791_s6 + $0x60] sm:$0xff]  ;;  %v988_v60 = vadd.f32 %v1820_v52, %v971_v56  ;;  %v97_v62 = vld [vmem:[%s2786_s1 + $0x190] sm:$0xff]  ;;  %v90_v63 = vld [vmem:[%s2786_s1 + $0x158] sm:$0xff] }
  0x22   :  { %v973_v0 = vld [vmem:[%s2791_s6 + $0x68] sm:$0xff]  ;;  %v989_v1 = vadd.f32 %v1820_v52, %v972_v59  ;;  %v974_v3 = vld [vmem:[%s2791_s6 + $0x70] sm:$0xff]  ;;  %v1003_v5 = vmax.f32 %v987_v58, 1e-06  ;;  %v975_v7 = vld [vmem:[%s2791_s6 + $0x78] sm:$0xff] }
  0x23   :  { %v1001_v61 = vmax.f32 %v985_v55, 1e-06  ;;  %v1002_v2 = vmax.f32 %v986_v57, 1e-06  ;;  %v990_v4 = vadd.f32 %v1820_v52, %v973_v0  ;;  %v1004_v6 = vmax.f32 %v988_v60, 1e-06 }
  0x24   :  { %v991_v8 = vadd.f32 %v1820_v52, %v974_v3  ;;  %v1005_v9 = vmax.f32 %v989_v1, 1e-06  ;;  %v992_v10 = vadd.f32 %v1820_v52, %v975_v7  ;;  %v962_v57 = vld [vmem:[%s2791_s6 + $0x10] sm:$0xff]  ;;  %v963_v58 = vld [vmem:[%s2791_s6 + $0x18] sm:$0xff]  ;;  %v1058_v60 = vld [vmem:[%s2789_s4 + $0x8] sm:$0xff] }
  0x25   :  { %232 = vperm.xlu1 %1538, %v58_v11   ;;  %227 = vperm.xlu0 %1537, %v57_v12   ;;  %1539 = vrsqrt.f32 %v1001_v61  ;;  %v1006_v11 = vmax.f32 %v990_v4, 1e-06  ;;  %v104_v12 = vld [vmem:[%s2786_s1 + $0x1c8] sm:$0xff]  ;;  %v109_v59 = vld [vmem:[%s2786_s1 + $0x1f0] sm:$0xff]  ;;  %v1059_v61 = vstv %s1869_s23  ;;  %v102_v1 = vld [vmem:[%s2786_s1 + $0x1b8] sm:$0xff] }
  0x26   :  { %1541 = vrsqrt.f32 %v1002_v2 }
  0x27   :  { %1543 = vrsqrt.f32 %v1003_v5  ;;  %v964_v5 = vld [vmem:[%s2791_s6 + $0x20] sm:$0xff] }
  0x28   :  { %1545 = vrsqrt.f32 %v1004_v6  ;;  %v965_v6 = vld [vmem:[%s2791_s6 + $0x28] sm:$0xff] }
  0x29   :  { %242 = vperm.xlu1 %1538, %v60_v13   ;;  %237 = vperm.xlu0 %1537, %v59_v14   ;;  %v103_v13 = vld [vmem:[%s2786_s1 + $0x1c0] sm:$0xff]  ;;  %v1007_v14 = vmax.f32 %v991_v8, 1e-06  ;;  %1547 = vrsqrt.f32 %v1005_v9  ;;  %v959_v8 = vld [vmem:[%s2792_s7 + $0x78] sm:$0xff] }
  0x2a   :  { %1549 = vrsqrt.f32 %v1006_v11  ;;  %v980_v11 = vadd.f32 %v1820_v52, %v963_v58  ;;  %v1372_v58 = vld [vmem:[%s2790_s5] sm:$0xff] }
  0x2b   :  { %1551 = vrsqrt.f32 %v1007_v14 }
  0x2d   :  { %252 = vperm.xlu1 %1538, %v62_v15   ;;  %247 = vperm.xlu0 %1537, %v61_v16   ;;  %v1008_v15 = vmax.f32 %v992_v10, 1e-06  ;;  %v101_v16 = vld [vmem:[%s2786_s1 + $0x1b0] sm:$0xff]  ;;  %v979_v10 = vadd.f32 %v1820_v52, %v962_v57  ;;  %v1373_v57 = vld [vmem:[%s2790_s5 + $0x8] sm:$0xff] }
  0x2f   :  { %1553 = vrsqrt.f32 %v1008_v15 }
  0x31   :  { %262 = vperm.xlu1 %1538, %v64_v17   ;;  %257 = vperm.xlu0 %1537, %v63_v18   ;;  %v94_v17 = vld [vmem:[%s2786_s1 + $0x178] sm:$0xff]  ;;  %v1540_v18 = vpop.eup %1539 }
  0x35   :  { %272 = vperm.xlu1 %1538, %v66_v19   ;;  %267 = vperm.xlu0 %1537, %v65_v20   ;;  %v952_v19 = vld [vmem:[%s2792_s7 + $0x40] sm:$0xff]  ;;  %v953_v20 = vld [vmem:[%s2792_s7 + $0x48] sm:$0xff] }
  0x39   :  { %282 = vperm.xlu1 %1538, %v68_v21   ;;  %277 = vperm.xlu0 %1537, %v67_v22   ;;  %v1542_v21 = vpop.eup %1541  ;;  %v108_v22 = vld [vmem:[%s2786_s1 + $0x1e8] sm:$0xff] }
  0x3d   :  { %292 = vperm.xlu1 %1538, %v70_v23   ;;  %287 = vperm.xlu0 %1537, %v69_v24   ;;  %v107_v23 = vld [vmem:[%s2786_s1 + $0x1e0] sm:$0xff]  ;;  %v954_v24 = vld [vmem:[%s2792_s7 + $0x50] sm:$0xff] }
  0x41   :  { %302 = vperm.xlu1 %1538, %v72_v25   ;;  %297 = vperm.xlu0 %1537, %v71_v26   ;;  %v1033_v25 = vmul.f32 %v1540_v18, %v952_v19  ;;  %v1544_v26 = vpop.eup %1543  ;;  %v110_v18 = vld [vmem:[%s2786_s1 + $0x1f8] sm:$0xff] }
  0x45   :  { %312 = vperm.xlu1 %1538, %v74_v27   ;;  %307 = vperm.xlu0 %1537, %v73_v28   ;;  %v955_v27 = vld [vmem:[%s2792_s7 + $0x58] sm:$0xff]  ;;  %v1034_v28 = vmul.f32 %v1542_v21, %v953_v20  ;;  %v982_v21 = vadd.f32 %v1820_v52, %v965_v6 }
  0x49   :  { %322 = vperm.xlu1 %1538, %v76_v29   ;;  %317 = vperm.xlu0 %1537, %v75_v30   ;;  %v960_v29 = vld [vmem:[%s2791_s6] sm:$0xff]  ;;  %v1546_v30 = vpop.eup %1545 }
  0x4d   :  { %332 = vperm.xlu1 %1538, %v78_v31   ;;  %327 = vperm.xlu0 %1537, %v77_v32   ;;  %v956_v31 = vld [vmem:[%s2792_s7 + $0x60] sm:$0xff]  ;;  %v1035_v32 = vmul.f32 %v1544_v26, %v954_v24 }
  0x51   :  { %342 = vperm.xlu1 %1538, %v80_v33   ;;  %337 = vperm.xlu0 %1537, %v79_v34   ;;  %v1049_v33 = vmul.f32 %v1033_v25, %v952_v19  ;;  %v1548_v34 = vpop.eup %1547 }
  0x55   :  { %352 = vperm.xlu1 %1538, %v82_v35   ;;  %347 = vperm.xlu0 %1537, %v81_v36   ;;  %v105_v35 = vld [vmem:[%s2786_s1 + $0x1d0] sm:$0xff]  ;;  %v957_v36 = vld [vmem:[%s2792_s7 + $0x68] sm:$0xff] }
  0x59   :  { %362 = vperm.xlu1 %1538, %v84_v37   ;;  %357 = vperm.xlu0 %1537, %v83_v38   ;;  %v1036_v37 = vmul.f32 %v1546_v30, %v955_v27  ;;  %v1050_v38 = vmul.f32 %v1034_v28, %v953_v20  ;;  %v981_v20 = vadd.f32 %v1820_v52, %v964_v5 }
  0x5b   :  { %v1125_v51 = vsel %vm623_vm0, %v1050_v38, 0.0 }
  0x5c   :  { %v1126_v55 = vrot.slane %v1125_v51, 4 }
  0x5d   :  { %382 = vperm.xlu1 %1538, %v88_v39   ;;  %377 = vperm.xlu0 %1537, %v87_v40   ;;  %v1550_v39 = vpop.eup %1549  ;;  %v98_v40 = vld [vmem:[%s2786_s1 + $0x198] sm:$0xff] }
  0x5e   :  { %v1127_v3 = vadd.f32 %v1126_v55, %v1125_v51  ;;  %v114_v55 = vld [vmem:[%s2787_s2 + $0x18] sm:$0xff] }
  0x61   :  { %397 = vperm.xlu1 %1538, %v91_v41   ;;  %367 = vperm.xlu0 %1537, %v85_v42   ;;  %v958_v41 = vld [vmem:[%s2792_s7 + $0x70] sm:$0xff]  ;;  %v1037_v42 = vmul.f32 %v1548_v34, %v956_v31 }
  0x63   :  { %v1053_v54 = vmul.f32 %v1037_v42, %v956_v31  ;;  %v995_v31 = vmax.f32 %v979_v10, 1e-06 }
  0x65   :  { %387 = vperm.xlu1 %1538, %v89_v43   ;;  %402 = vperm.xlu0 %1537, %v92_v44   ;;  %v1051_v43 = vmul.f32 %v1035_v32, %v954_v24  ;;  %v1118_v44 = vsel %vm623_vm0, %v1049_v33, 0.0  ;;  %v1146_v9 = vsel %vm623_vm0, %v1053_v54, 0.0  ;;  %v1057_v24 = vld [vmem:[%s2789_s4] sm:$0xff]  ;;  %v996_v32 = vmax.f32 %v980_v11, 1e-06 }
  0x66   :  { %v1147_v28 = vrot.slane %v1146_v9, 4 }
  0x67   :  { %v1132_v56 = vsel %vm623_vm0, %v1051_v43, 0.0 }
  0x69   :  { %422 = vperm.xlu1 %1538, %v96_v45   ;;  %417 = vperm.xlu0 %1537, %v95_v46   ;;  %v961_v45 = vld [vmem:[%s2791_s6 + $0x8] sm:$0xff]  ;;  %v977_v46 = vadd.f32 %v1820_v52, %v960_v29  ;;  %v967_v29 = vld [vmem:[%s2791_s6 + $0x38] sm:$0xff] }
  0x6a   :  { %v978_v0 = vadd.f32 %v1820_v52, %v961_v45  ;;  %v1965_v38 = vadd.f32 %v1820_v52, %v967_v29 }
  0x6d   :  { %407 = vperm.xlu1 %1538, %v93_v47   ;;  %372 = vperm.xlu0 %1537, %v86_v48   ;;  %v1552_v47 = vpop.eup %1551  ;;  %v1038_v48 = vmul.f32 %v1550_v39, %v957_v36  ;;  %v997_v39 = vmax.f32 %v981_v20, 1e-06 }
  0x6e   :  { %v1039_v53 = vmul.f32 %v1552_v47, %v958_v41  ;;  %v1554_v7 = vpop.eup %1553 }
  0x6f   :  { %v1040_v25 = vmul.f32 %v1554_v7, %v959_v8 }
  0x70   :  { %v1055_v14 = vmul.f32 %v1039_v53, %v958_v41 }
  0x71   :  { %442 = vperm.xlu1 %1538, %v100_v49   ;;  %437 = vperm.xlu0 %1537, %v99_v50   ;;  %v1052_v49 = vmul.f32 %v1036_v37, %v955_v27  ;;  %v1119_v50 = vrot.slane %v1118_v44, 4  ;;  %v1128_v27 = vrot.slane %v1127_v3, 2  ;;  %v1060_v37 = vadd.f32 %v1059_v61, %v1057_v24 }
  0x72   :  { %v1056_v41 = vmul.f32 %v1040_v25, %v959_v8 }
  0x73   :  { %v1120_v2 = vadd.f32 %v1119_v50, %v1118_v44  ;;  %v1139_v4 = vsel %vm623_vm0, %v1052_v49, 0.0  ;;  %v1129_v43 = vadd.f32 %v1128_v27, %v1127_v3  ;;  %v1148_v44 = vadd.f32 %v1147_v28, %v1146_v9 }
  0x75   :  { %427 = vperm.xlu1 %1538, %v97_v62   ;;  %392 = vperm.xlu0 %1537, %v90_v63   ;;  %v1054_v62 = vmul.f32 %v1038_v48, %v957_v36  ;;  %v1133_v63 = vrot.slane %v1132_v56, 4  ;;  %v1121_v26 = vrot.slane %v1120_v2, 2  ;;  %v1160_v36 = vsel %vm623_vm0, %v1055_v14, 0.0  ;;  %v113_v48 = vld [vmem:[%s2787_s2 + $0x10] sm:$0xff] }
  0x76   :  { %v1161_v45 = vrot.slane %v1160_v36, 4 }
  0x77   :  { %v1134_v15 = vadd.f32 %v1133_v63, %v1132_v56  ;;  %v1153_v19 = vsel %vm623_vm0, %v1054_v62, 0.0  ;;  %v1122_v42 = vadd.f32 %v1121_v26, %v1120_v2  ;;  %v112_v56 = vld [vmem:[%s2787_s2 + $0x8] sm:$0xff]  ;;  %v1167_v62 = vsel %vm623_vm0, %v1056_v41, 0.0 }
  0x78   :  { %v1168_v11 = vrot.slane %v1167_v62, 4 }
  0x79   :  { %462 = vperm.xlu1 %1538, %v104_v12   ;;  %457 = vperm.xlu0 %1537, %v103_v13   ;;  %v993_v12 = vmax.f32 %v977_v46, 1e-06  ;;  %v1061_v13 = vadd.f32 %v1059_v61, %v1058_v60  ;;  %v1135_v33 = vrot.slane %v1134_v15, 2  ;;  %v998_v46 = vmax.f32 %v982_v21, 1e-06 }
  0x7a   :  { %v1130_v60 = vrot.slane %v1129_v43, 1  ;;  %v1149_v61 = vrot.slane %v1148_v44, 2 }
  0x7b   :  { %1555 = vrsqrt.f32 %v993_v12  ;;  %v1136_v50 = vadd.f32 %v1135_v33, %v1134_v15  ;;  %v116_v12 = vld [vmem:[%s2787_s2 + $0x28] sm:$0xff] }
  0x7c   :  { %v1131_v15 = vadd.f32 %v1130_v60, %v1129_v43  ;;  %v119_v60 = vld [vmem:[%s2787_s2 + $0x40] sm:$0xff] }
  0x7d   :  { %447 = vperm.xlu1 %1538, %v101_v16   ;;  %412 = vperm.xlu0 %1537, %v94_v17   ;;  %v1140_v16 = vrot.slane %v1139_v4, 4  ;;  %v966_v17 = vld [vmem:[%s2791_s6 + $0x30] sm:$0xff] }
  0x7e   :  { %v983_v30 = vadd.f32 %v1820_v52, %v966_v17 }
  0x7f   :  { %v1141_v34 = vadd.f32 %v1140_v16, %v1139_v4  ;;  %v1137_v4 = vrot.slane %v1136_v50, 1  ;;  %v1150_v16 = vadd.f32 %v1149_v61, %v1148_v44 }
  0x80   :  { %v999_v47 = vmax.f32 %v983_v30, 1e-06 }
  0x81   :  { %482 = vperm.xlu1 %1538, %v108_v22   ;;  %477 = vperm.xlu0 %1537, %v107_v23   ;;  %v994_v22 = vmax.f32 %v978_v0, 1e-06  ;;  %v106_v23 = vld [vmem:[%s2786_s1 + $0x1d8] sm:$0xff]  ;;  %v1142_v51 = vrot.slane %v1141_v34, 2  ;;  %v1162_v0 = vadd.f32 %v1161_v45, %v1160_v36  ;;  %v1138_v24 = vadd.f32 %v1137_v4, %v1136_v50 }
  0x82   :  { %v1151_v36 = vrot.slane %v1150_v16, 1 }
  0x83   :  { %1557 = vrsqrt.f32 %v994_v22  ;;  %v1143_v5 = vadd.f32 %v1142_v51, %v1141_v34  ;;  %v1163_v20 = vrot.slane %v1162_v0, 2  ;;  %v118_v34 = vld [vmem:[%s2787_s2 + $0x38] sm:$0xff] }
  0x84   :  { %1559 = vrsqrt.f32 %v995_v31  ;;  %v1152_v4 = vadd.f32 %v1151_v36, %v1150_v16  ;;  %v124_v36 = vld [vmem:[%s2787_s2 + $0x68] sm:$0xff] }
  0x85   :  { %467 = vperm.xlu1 %1538, %v105_v35   ;;  %432 = vperm.xlu0 %1537, %v98_v40   ;;  %v1154_v35 = vrot.slane %v1153_v19, 4  ;;  %v111_v40 = vld [vmem:[%s2787_s2] sm:$0xff]  ;;  %1561 = vrsqrt.f32 %v996_v32  ;;  %v1987_v7 = vpop.eup %1555  ;;  %v1144_v25 = vrot.slane %v1143_v5, 1 }
  0x86   :  { %1563 = vrsqrt.f32 %v997_v39 }
  0x87   :  { %v1155_v53 = vadd.f32 %v1154_v35, %v1153_v19  ;;  %1565 = vrsqrt.f32 %v998_v46  ;;  %v117_v35 = vld [vmem:[%s2787_s2 + $0x30] sm:$0xff] }
  0x88   :  { %1567 = vrsqrt.f32 %v999_v47 }
  0x89   :  { %487 = vperm.xlu1 %1538, %v109_v59   ;;  %452 = vperm.xlu0 %1537, %v102_v1   ;;  %v1123_v59 = vrot.slane %v1122_v42, 1  ;;  %v1000_v1 = vmax.f32 %v1965_v38, 1e-06  ;;  %v1156_v6 = vrot.slane %v1155_v53, 2 }
  0x8b   :  { %v1124_v14 = vadd.f32 %v1123_v59, %v1122_v42  ;;  %v1997_v26 = vadd.f32 %v1156_v6, %v1155_v53  ;;  %v120_v59 = vld [vmem:[%s2787_s2 + $0x48] sm:$0xff]  ;;  %1569 = vrsqrt.f32 %v1000_v1  ;;  %v122_v1 = vld [vmem:[%s2787_s2 + $0x58] sm:$0xff] }
  0x8c   :  { %v945_v6 = vld [vmem:[%s2792_s7 + $0x8] sm:$0xff] }
  0x8d   :  { %492 = vperm.xlu1 %1538, %v110_v18   ;;  %472 = vperm.xlu0 %1537, %v106_v23   ;;  %v1995_v17 = vpop.eup %1557  ;;  %v1214_v43 = vsel %vm1200_vm1, %v1131_v15, %v1124_v14 }
  0x8e   :  { %v1999_v27 = vpop.eup %1559 }
  0x8f   :  { %v2003_v32 = vpop.eup %1561 }
  0x90   :  { %v188_v52 = vpop.permute.xlu1 %187  ;;  %v178_v49 = vpop.permute.xlu0 %177 }
  0x91   :  { %v495_v54 = vsub.f32 %v178_v49, %v111_v40  ;;  %1181 = vperm.xlu1 %1538, %v1061_v13   ;;  %1176 = vperm.xlu0 %1537, %v1060_v37   ;;  %v497_v63 = vsub.f32 %v188_v52, %v113_v48  ;;  %v115_v13 = vld [vmem:[%s2787_s2 + $0x20] sm:$0xff]  ;;  %v1169_v37 = vadd.f32 %v1168_v11, %v1167_v62  ;;  %v2011_v39 = vpop.eup %1563 }
  0x92   :  { %v1145_v48 = vadd.f32 %v1144_v25, %v1143_v5  ;;  %v1164_v52 = vadd.f32 %v1163_v20, %v1162_v0  ;;  %v2016_v49 = vpop.eup %1565  ;;  %v1215_v62 = vsel %vm1202_vm2, %v1138_v24, %v1214_v43  ;;  %v1158_v5 = vrot.slane %v1997_v26, 1 }
  0x93   :  { %v559_v8 = vmul.f32 %v495_v54, %v495_v54  ;;  %v561_v18 = vmul.f32 %v497_v63, %v497_v63  ;;  %v1170_v61 = vrot.slane %v1169_v37, 2  ;;  %v1026_v20 = vmul.f32 %v1995_v17, %v945_v6  ;;  %v2066_v17 = vld [vmem:[%s2792_s7 + $0x20] sm:$0xff] }
  0x94   :  { %v193_v2 = vpop.permute.xlu1 %192  ;;  %v183_v3 = vpop.permute.xlu0 %182  ;;  %v1165_v14 = vrot.slane %v1164_v52, 1  ;;  %v1159_v24 = vadd.f32 %v1158_v5, %v1997_v26 }
  0x95   :  { %v498_v9 = vsub.f32 %v193_v2, %v114_v55  ;;  %v496_v10 = vsub.f32 %v183_v3, %v112_v56  ;;  %1380 = vperm.xlu1 %1538, %v1373_v57   ;;  %1376 = vperm.xlu0 %1537, %v1372_v58   ;;  %v624_v28 = vsel %vm623_vm0, %v559_v8, 0.0  ;;  %v627_v40 = vsel %vm623_vm0, %v561_v18, 0.0  ;;  %v944_v55 = vld [vmem:[%s2792_s7] sm:$0xff]  ;;  %v2023_v56 = vpop.eup %1567 }
  0x96   :  { %v1025_v8 = vmul.f32 %v1987_v7, %v944_v55  ;;  %v1171_v15 = vadd.f32 %v1170_v61, %v1169_v37  ;;  %v123_v37 = vld [vmem:[%s2787_s2 + $0x60] sm:$0xff]  ;;  %v126_v61 = vld [vmem:[%s2787_s2 + $0x78] sm:$0xff] }
  0x97   :  { %v560_v19 = vmul.f32 %v496_v10, %v496_v10  ;;  %v562_v21 = vmul.f32 %v498_v9, %v498_v9 }
  0x98   :  { %v203_v22 = vpop.permute.xlu1 %202  ;;  %v198_v23 = vpop.permute.xlu0 %197 }
  0x99   :  { %v625_v29 = vsel %vm623_vm0, %v560_v19, 0.0  ;;  %v500_v30 = vsub.f32 %v203_v22, %v116_v12  ;;  %v499_v31 = vsub.f32 %v198_v23, %v115_v13  ;;  %v629_v44 = vsel %vm623_vm0, %v562_v21, 0.0  ;;  %v121_v13 = vld [vmem:[%s2787_s2 + $0x50] sm:$0xff] }
  0x9a   :  { %v626_v33 = vadd.f32 %v625_v29, %v624_v28  ;;  %v1216_v12 = vsel %vm1204_vm3, %v1145_v48, %v1215_v62  ;;  %v946_v19 = vld [vmem:[%s2792_s7 + $0x10] sm:$0xff]  ;;  %v1041_v28 = vmul.f32 %v1025_v8, %v944_v55 }
  0x9b   :  { %v564_v41 = vmul.f32 %v500_v30, %v500_v30  ;;  %v563_v42 = vmul.f32 %v499_v31, %v499_v31  ;;  %v1217_v25 = vsel %vm1206_vm4, %v1152_v4, %v1216_v12 }
  0x9c   :  { %v628_v45 = vadd.f32 %v627_v40, %v626_v33  ;;  %v213_v46 = vpop.permute.xlu1 %212  ;;  %v208_v47 = vpop.permute.xlu0 %207  ;;  %v1172_v40 = vrot.slane %v1171_v15, 1 }
  0x9d   :  { %v638_v50 = vsel %vm623_vm0, %v564_v41, 0.0  ;;  %v637_v51 = vsel %vm623_vm0, %v563_v42, 0.0  ;;  %v502_v53 = vsub.f32 %v213_v46, %v118_v34  ;;  %v501_v54 = vsub.f32 %v208_v47, %v117_v35  ;;  %v2061_v34 = vld [vmem:[%s2792_s7 + $0x18] sm:$0xff] }
  0x9e   :  { %v2025_v57 = vadd.f32 %v629_v44, %v628_v45  ;;  %v639_v58 = vadd.f32 %v638_v50, %v637_v51  ;;  %v1027_v41 = vmul.f32 %v1999_v27, %v946_v19  ;;  %v1166_v44 = vadd.f32 %v1165_v14, %v1164_v52 }
  0x9f   :  { %v566_v63 = vmul.f32 %v502_v53, %v502_v53  ;;  %v565_v0 = vmul.f32 %v501_v54, %v501_v54  ;;  %v1042_v45 = vmul.f32 %v1026_v20, %v945_v6  ;;  %v1218_v50 = vsel %vm1208_vm5, %v1159_v24, %v1217_v25  ;;  %v1570_v54 = vpop.eup %1569 }
  0xa0   :  { %v223_v2 = vpop.permute.xlu1 %222  ;;  %v218_v3 = vpop.permute.xlu0 %217  ;;  %v631_v26 = vrot.slane %v2025_v57, 4  ;;  %v1028_v51 = vmul.f32 %v2003_v32, %v2061_v34  ;;  %v1029_v53 = vmul.f32 %v2011_v39, %v2066_v17  ;;  %v125_v32 = vld [vmem:[%s2787_s2 + $0x70] sm:$0xff]  ;;  %v1173_v62 = vadd.f32 %v1172_v40, %v1171_v15  ;;  %v130_v40 = vld [vmem:[%s2787_s2 + $0x98] sm:$0xff] }
  0xa1   :  { %v640_v9 = vsel %vm623_vm0, %v565_v0, 0.0  ;;  %v504_v10 = vsub.f32 %v223_v2, %v120_v59  ;;  %v503_v11 = vsub.f32 %v218_v3, %v119_v60  ;;  %v642_v7 = vsel %vm623_vm0, %v566_v63, 0.0  ;;  %v949_v3 = vld [vmem:[%s2792_s7 + $0x28] sm:$0xff] }
  0xa2   :  { %v641_v38 = vadd.f32 %v640_v9, %v639_v58  ;;  %v1062_v59 = vsel %vm623_vm0, %v1041_v28, 0.0  ;;  %v632_v52 = vadd.f32 %v631_v26, %v2025_v57  ;;  %v1043_v39 = vmul.f32 %v1027_v41, %v946_v19 }
  0xa3   :  { %v568_v16 = vmul.f32 %v504_v10, %v504_v10  ;;  %v567_v18 = vmul.f32 %v503_v11, %v503_v11  ;;  %v1069_v57 = vsel %vm623_vm0, %v1042_v45, 0.0  ;;  %v1219_v9 = vsel %vm1210_vm6, %v1166_v44, %v1218_v50  ;;  %v950_v10 = vld [vmem:[%s2792_s7 + $0x30] sm:$0xff] }
  0xa4   :  { %v643_v21 = vadd.f32 %v642_v7, %v641_v38  ;;  %v233_v22 = vpop.permute.xlu1 %232  ;;  %v228_v23 = vpop.permute.xlu0 %227  ;;  %v1063_v11 = vrot.slane %v1062_v59, 4  ;;  %v633_v14 = vrot.slane %v632_v52, 2  ;;  %v128_v7 = vld [vmem:[%s2787_s2 + $0x88] sm:$0xff]  ;;  %v1030_v19 = vmul.f32 %v2016_v49, %v949_v3 }
  0xa5   :  { %v651_v29 = vsel %vm623_vm0, %v568_v16, 0.0  ;;  %v650_v30 = vsel %vm623_vm0, %v567_v18, 0.0  ;;  %v506_v31 = vsub.f32 %v233_v22, %v122_v1  ;;  %v505_v33 = vsub.f32 %v228_v23, %v121_v13  ;;  %v127_v16 = vld [vmem:[%s2787_s2 + $0x80] sm:$0xff]  ;;  %v951_v18 = vld [vmem:[%s2792_s7 + $0x38] sm:$0xff] }
  0xa6   :  { %v652_v35 = vadd.f32 %v651_v29, %v650_v30  ;;  %v644_v46 = vrot.slane %v643_v21, 4  ;;  %v1070_v20 = vrot.slane %v1069_v57, 4  ;;  %v2112_v22 = vsel %vm2794_vm7, %v1173_v62, %v1219_v9 }
  0xa7   :  { %v570_v42 = vmul.f32 %v506_v31, %v506_v31  ;;  %v569_v43 = vmul.f32 %v505_v33, %v505_v33  ;;  %v1031_v23 = vmul.f32 %v2023_v56, %v950_v10  ;;  %v1076_v24 = vsel %vm623_vm0, %v1043_v39, 0.0 }
  0xa8   :  { %v243_v47 = vpop.permute.xlu1 %242  ;;  %v238_v48 = vpop.permute.xlu0 %237  ;;  %v645_v4 = vadd.f32 %v644_v46, %v643_v21  ;;  %v1064_v33 = vadd.f32 %v1063_v11, %v1062_v59  ;;  %v1032_v49 = vmul.f32 %v1570_v54, %v951_v18  ;;  %v1044_v56 = vmul.f32 %v1028_v51, %v2061_v34  ;;  %v129_v46 = vld [vmem:[%s2787_s2 + $0x90] sm:$0xff] }
  0xa9   :  { %v653_v55 = vsel %vm623_vm0, %v569_v43, 0.0  ;;  %v508_v58 = vsub.f32 %v243_v47, %v124_v36  ;;  %v507_v27 = vsub.f32 %v238_v48, %v123_v37  ;;  %v655_v63 = vsel %vm623_vm0, %v570_v42, 0.0 }
  0xaa   :  { %v654_v60 = vadd.f32 %v653_v55, %v652_v35  ;;  %v646_v25 = vrot.slane %v645_v4, 2  ;;  %v634_v37 = vadd.f32 %v633_v14, %v632_v52  ;;  %v2122_v41 = vmul.f32 %v1029_v53, %v2066_v17 }
  0xab   :  { %v572_v0 = vmul.f32 %v508_v58, %v508_v58  ;;  %v571_v2 = vmul.f32 %v507_v27, %v507_v27  ;;  %v1071_v42 = vadd.f32 %v1070_v20, %v1069_v57  ;;  %v1077_v47 = vrot.slane %v1076_v24, 4  ;;  %v133_v20 = vld [vmem:[%s2787_s2 + $0xb0] sm:$0xff] }
  0xac   :  { %v656_v5 = vadd.f32 %v655_v63, %v654_v60  ;;  %v253_v6 = vpop.permute.xlu1 %252  ;;  %v248_v8 = vpop.permute.xlu0 %247  ;;  %v647_v48 = vadd.f32 %v646_v25, %v645_v4  ;;  %v1065_v27 = vrot.slane %v1064_v33, 2  ;;  %v132_v60 = vld [vmem:[%s2787_s2 + $0xa8] sm:$0xff]  ;;  %v1083_v62 = vsel %vm623_vm0, %v1044_v56, 0.0  ;;  %v135_v56 = vld [vmem:[%s2787_s2 + $0xc0] sm:$0xff] }
  0xad   :  { %v664_v12 = vsel %vm623_vm0, %v572_v0, 0.0  ;;  %v663_v38 = vsel %vm623_vm0, %v571_v2, 0.0  ;;  %v510_v1 = vsub.f32 %v253_v6, %v126_v61  ;;  %v509_v13 = vsub.f32 %v248_v8, %v125_v32  ;;  %v131_v61 = vld [vmem:[%s2787_s2 + $0xa0] sm:$0xff] }
  0xae   :  { %v665_v15 = vadd.f32 %v664_v12, %v663_v38  ;;  %v657_v28 = vrot.slane %v656_v5, 4  ;;  %v1072_v32 = vrot.slane %v1071_v42, 2  ;;  %v635_v39 = vrot.slane %v634_v37, 1 }
  0xaf   :  { %v573_v21 = vmul.f32 %v509_v13, %v509_v13  ;;  %v574_v29 = vmul.f32 %v510_v1, %v510_v1  ;;  %v2137_v63 = vmul.f32 %v1030_v19, %v949_v3  ;;  %v2139_v0 = vmul.f32 %v1031_v23, %v950_v10  ;;  %v134_v19 = vld [vmem:[%s2787_s2 + $0xb8] sm:$0xff] }
  0xb0   :  { %v263_v30 = vpop.permute.xlu1 %262  ;;  %v258_v31 = vpop.permute.xlu0 %257  ;;  %v658_v50 = vadd.f32 %v657_v28, %v656_v5  ;;  %v1078_v2 = vadd.f32 %v1077_v47, %v1076_v24  ;;  %v1066_v9 = vadd.f32 %v1065_v27, %v1064_v33  ;;  %v648_v11 = vrot.slane %v647_v48, 1 }
  0xb1   :  { %v666_v26 = vsel %vm623_vm0, %v573_v21, 0.0  ;;  %v512_v35 = vsub.f32 %v263_v30, %v128_v7  ;;  %v511_v36 = vsub.f32 %v258_v31, %v127_v16  ;;  %v668_v54 = vsel %vm623_vm0, %v574_v29, 0.0 }
  0xb2   :  { %v667_v43 = vadd.f32 %v666_v26, %v665_v15  ;;  %v659_v57 = vrot.slane %v658_v50, 2  ;;  %v1084_v1 = vrot.slane %v1083_v62, 4  ;;  %v2142_v15 = vmul.f32 %v1032_v49, %v951_v18 }
  0xb3   :  { %v576_v44 = vmul.f32 %v512_v35, %v512_v35  ;;  %v575_v45 = vmul.f32 %v511_v36, %v511_v36  ;;  %v1073_v3 = vadd.f32 %v1072_v32, %v1071_v42  ;;  %v1079_v21 = vrot.slane %v1078_v2, 2 }
  0xb4   :  { %v273_v55 = vpop.permute.xlu1 %272  ;;  %v268_v58 = vpop.permute.xlu0 %267  ;;  %v669_v34 = vadd.f32 %v668_v54, %v667_v43  ;;  %v2150_v23 = vadd.f32 %v635_v39, %v634_v37  ;;  %v660_v24 = vadd.f32 %v659_v57, %v658_v50  ;;  %v1067_v29 = vrot.slane %v1066_v9, 1  ;;  %v136_v37 = vld [vmem:[%s2787_s2 + $0xc8] sm:$0xff] }
  0xb5   :  { %v677_v17 = vsel %vm623_vm0, %v576_v44, 0.0  ;;  %v676_v51 = vsel %vm623_vm0, %v575_v45, 0.0  ;;  %v514_v53 = vsub.f32 %v273_v55, %v130_v40  ;;  %v513_v52 = vsub.f32 %v268_v58, %v129_v46 }
  0xb6   :  { %v678_v59 = vadd.f32 %v677_v17, %v676_v51  ;;  %v670_v13 = vrot.slane %v669_v34, 4  ;;  %v2153_v30 = vadd.f32 %v648_v11, %v647_v48  ;;  %v1085_v26 = vadd.f32 %v1084_v1, %v1083_v62 }
  0xb7   :  { %v578_v4 = vmul.f32 %v514_v53, %v514_v53  ;;  %v577_v5 = vmul.f32 %v513_v52, %v513_v52  ;;  %v1074_v44 = vrot.slane %v1073_v3, 1  ;;  %v1080_v45 = vadd.f32 %v1079_v21, %v1078_v2  ;;  %v138_v53 = vld [vmem:[%s2787_s2 + $0xd8] sm:$0xff] }
  0xb8   :  { %v283_v6 = vpop.permute.xlu1 %282  ;;  %v278_v8 = vpop.permute.xlu0 %277  ;;  %v671_v35 = vadd.f32 %v670_v13, %v669_v34  ;;  %1571 = vrsqrt.f32 %v2150_v23  ;;  %v661_v46 = vrot.slane %v660_v24, 1  ;;  %v1090_v54 = vsel %vm623_vm0, %v2122_v41, 0.0 }
  0xb9   :  { %v516_v12 = vsub.f32 %v283_v6, %v132_v60  ;;  %v515_v38 = vsub.f32 %v278_v8, %v131_v61  ;;  %v679_v14 = vsel %vm623_vm0, %v577_v5, 0.0  ;;  %v681_v25 = vsel %vm623_vm0, %v578_v4, 0.0 }
  0xba   :  { %v680_v7 = vadd.f32 %v679_v14, %v678_v59  ;;  %v2166_v34 = vadd.f32 %v1067_v29, %v1066_v9  ;;  %1573 = vrsqrt.f32 %v2153_v30  ;;  %v672_v17 = vrot.slane %v671_v35, 2  ;;  %v137_v59 = vld [vmem:[%s2787_s2 + $0xd0] sm:$0xff]  ;;  %v140_v14 = vld [vmem:[%s2787_s2 + $0xe8] sm:$0xff] }
  0xbb   :  { %v580_v10 = vmul.f32 %v516_v12, %v516_v12  ;;  %v579_v16 = vmul.f32 %v515_v38, %v515_v38  ;;  %v1086_v52 = vrot.slane %v1085_v26, 2  ;;  %v2176_v60 = vadd.f32 %v1074_v44, %v1073_v3 }
  0xbc   :  { %v293_v18 = vpop.permute.xlu1 %292  ;;  %v288_v28 = vpop.permute.xlu0 %287  ;;  %v682_v31 = vadd.f32 %v681_v25, %v680_v7  ;;  %v1081_v61 = vrot.slane %v1080_v45, 1  ;;  %v1091_v32 = vrot.slane %v1090_v54, 4  ;;  %v2178_v62 = vadd.f32 %v661_v46, %v660_v24 }
  0xbd   :  { %v690_v33 = vsel %vm623_vm0, %v580_v10, 0.0  ;;  %v689_v36 = vsel %vm623_vm0, %v579_v16, 0.0  ;;  %v518_v49 = vsub.f32 %v293_v18, %v134_v19  ;;  %v517_v40 = vsub.f32 %v288_v28, %v133_v20  ;;  %v139_v19 = vld [vmem:[%s2787_s2 + $0xe0] sm:$0xff] }
  0xbe   :  { %v683_v42 = vrot.slane %v682_v31, 4  ;;  %v691_v43 = vadd.f32 %v690_v33, %v689_v36  ;;  %v1097_v11 = vsel %vm623_vm0, %v2137_v63, 0.0  ;;  %v673_v12 = vadd.f32 %v672_v17, %v671_v35 }
  0xbf   :  { %v581_v47 = vmul.f32 %v517_v40, %v517_v40  ;;  %v582_v55 = vmul.f32 %v518_v49, %v518_v49  ;;  %1575 = vrsqrt.f32 %v2178_v62  ;;  %v2192_v24 = vadd.f32 %v1086_v52, %v1085_v26  ;;  %v142_v40 = vld [vmem:[%s2787_s2 + $0xf8] sm:$0xff]  ;;  %v141_v26 = vld [vmem:[%s2787_s2 + $0xf0] sm:$0xff]  ;;  %v143_v52 = vld [vmem:[%s2787_s2 + $0x100] sm:$0xff] }
  0xc0   :  { %v303_v48 = vpop.permute.xlu1 %302  ;;  %v298_v50 = vpop.permute.xlu0 %297  ;;  %v684_v41 = vadd.f32 %v683_v42, %v682_v31  ;;  %v1092_v25 = vadd.f32 %v1091_v32, %v1090_v54  ;;  %v2195_v29 = vadd.f32 %v1081_v61, %v1080_v45  ;;  %v1104_v31 = vsel %vm623_vm0, %v2139_v0, 0.0 }
  0xc1   :  { %v520_v58 = vsub.f32 %v303_v48, %v136_v37  ;;  %v519_v27 = vsub.f32 %v298_v50, %v135_v56  ;;  %v692_v51 = vsel %vm623_vm0, %v581_v47, 0.0  ;;  %v694_v6 = vsel %vm623_vm0, %v582_v55, 0.0 }
  0xc2   :  { %v693_v39 = vadd.f32 %v692_v51, %v691_v43  ;;  %v685_v3 = vrot.slane %v684_v41, 2  ;;  %v2199_v33 = vpop.eup %1571  ;;  %v1098_v37 = vrot.slane %v1097_v11, 4  ;;  %v674_v56 = vrot.slane %v673_v12, 1 }
  0xc3   :  { %v584_v2 = vmul.f32 %v520_v58, %v520_v58  ;;  %v583_v57 = vmul.f32 %v519_v27, %v519_v27  ;;  %v1105_v50 = vrot.slane %v1104_v31, 4  ;;  %v1111_v54 = vsel %vm623_vm0, %v2142_v15, 0.0 }
  0xc4   :  { %v313_v4 = vpop.permute.xlu1 %312  ;;  %v308_v5 = vpop.permute.xlu0 %307  ;;  %v695_v38 = vadd.f32 %v694_v6, %v693_v39  ;;  %v686_v42 = vadd.f32 %v685_v3, %v684_v41  ;;  %v1093_v41 = vrot.slane %v1092_v25, 2  ;;  %v1099_v61 = vadd.f32 %v1098_v37, %v1097_v11 }
  0xc5   :  { %v522_v8 = vsub.f32 %v313_v4, %v138_v53  ;;  %v521_v9 = vsub.f32 %v308_v5, %v137_v59  ;;  %v703_v1 = vsel %vm623_vm0, %v584_v2, 0.0  ;;  %v702_v13 = vsel %vm623_vm0, %v583_v57, 0.0  ;;  %v2208_v0 = vpop.eup %1573  ;;  %v144_v59 = vld [vmem:[%s2787_s2 + $0x108] sm:$0xff] }
  0xc6   :  { %v704_v7 = vadd.f32 %v703_v1, %v702_v13  ;;  %v696_v63 = vrot.slane %v695_v38, 4  ;;  %v2220_v32 = vadd.f32 %v674_v56, %v673_v12  ;;  %v687_v15 = vrot.slane %v686_v42, 1  ;;  %v146_v12 = vld [vmem:[%s2787_s2 + $0x118] sm:$0xff] }
  0xc7   :  { %v586_v10 = vmul.f32 %v522_v8, %v522_v8  ;;  %v585_v16 = vmul.f32 %v521_v9, %v521_v9  ;;  %v1106_v8 = vadd.f32 %v1105_v50, %v1104_v31  ;;  %v1112_v9 = vrot.slane %v1111_v54, 4 }
  0xc8   :  { %v323_v20 = vpop.permute.xlu1 %322  ;;  %v318_v21 = vpop.permute.xlu0 %317  ;;  %v697_v35 = vadd.f32 %v696_v63, %v695_v38  ;;  %1577 = vrsqrt.f32 %v2220_v32  ;;  %vm841_vm8 = vcmp.eq.f32.partialorder %v2153_v30, inf  ;;  %vm848_vm9 = vcmp.eq.f32.partialorder %v2178_v62, inf }
  0xc9   :  { %v705_v18 = vsel %vm623_vm0, %v585_v16, 0.0  ;;  %v524_v28 = vsub.f32 %v323_v20, %v140_v14  ;;  %v523_v49 = vsub.f32 %v318_v21, %v139_v19  ;;  %v707_v43 = vsel %vm623_vm0, %v586_v10, 0.0  ;;  %v2223_v3 = vpop.eup %1575  ;;  %v145_v20 = vld [vmem:[%s2787_s2 + $0x110] sm:$0xff] }
  0xca   :  { %v706_v36 = vadd.f32 %v705_v18, %v704_v7  ;;  %v698_v55 = vrot.slane %v697_v35, 2  ;;  %v1088_v10 = vrot.slane %v2192_v24, 1  ;;  %v1094_v16 = vadd.f32 %v1093_v41, %v1092_v25 }
  0xcb   :  { %v588_v44 = vmul.f32 %v524_v28, %v524_v28  ;;  %v587_v46 = vmul.f32 %v523_v49, %v523_v49  ;;  %v1100_v21 = vrot.slane %v1099_v61, 2  ;;  %v2233_v18 = vadd.f32 %v687_v15, %v686_v42 }
  0xcc   :  { %v708_v45 = vadd.f32 %v707_v43, %v706_v36  ;;  %v333_v47 = vpop.permute.xlu1 %332  ;;  %v328_v48 = vpop.permute.xlu0 %327  ;;  %v699_v38 = vadd.f32 %v698_v55, %v697_v35  ;;  %v1107_v49 = vrot.slane %v1106_v8, 2  ;;  %v1113_v37 = vadd.f32 %v1112_v9, %v1111_v54  ;;  %v148_v54 = vld [vmem:[%s2787_s2 + $0x128] sm:$0xff] }
  0xcd   :  { %v716_v58 = vsel %vm623_vm0, %v588_v44, 0.0  ;;  %v526_v27 = vsub.f32 %v333_v47, %v142_v40  ;;  %v525_v17 = vsub.f32 %v328_v48, %v141_v26  ;;  %v715_v53 = vsel %vm623_vm0, %v587_v46, 0.0 }
  0xce   :  { %v709_v51 = vrot.slane %v708_v45, 4  ;;  %v717_v39 = vadd.f32 %v716_v58, %v715_v53  ;;  %v700_v40 = vrot.slane %v699_v38, 1  ;;  %v1089_v42 = vadd.f32 %v1088_v10, %v2192_v24 }
  0xcf   :  { %v589_v2 = vmul.f32 %v525_v17, %v525_v17  ;;  %v590_v4 = vmul.f32 %v526_v27, %v526_v27  ;;  %v1095_v47 = vrot.slane %v1094_v16, 1  ;;  %v1201_v48 = vsel %vm1200_vm1, %v2176_v60, %v2166_v34  ;;  %v147_v27 = vld [vmem:[%s2787_s2 + $0x120] sm:$0xff] }
  0xd0   :  { %v710_v57 = vadd.f32 %v709_v51, %v708_v45  ;;  %v343_v5 = vpop.permute.xlu1 %342  ;;  %v338_v6 = vpop.permute.xlu0 %337  ;;  %1579 = vrsqrt.f32 %v2233_v18  ;;  %v1101_v24 = vadd.f32 %v1100_v21, %v1099_v61  ;;  %v2249_v51 = vadd.f32 %v700_v40, %v699_v38 }
  0xd1   :  { %v718_v1 = vsel %vm623_vm0, %v589_v2, 0.0  ;;  %v528_v13 = vsub.f32 %v343_v5, %v144_v59  ;;  %v527_v14 = vsub.f32 %v338_v6, %v143_v52  ;;  %v720_v31 = vsel %vm623_vm0, %v590_v4, 0.0 }
  0xd2   :  { %v711_v7 = vrot.slane %v710_v57, 2  ;;  %v719_v11 = vadd.f32 %v718_v1, %v717_v39  ;;  %v1108_v34 = vadd.f32 %v1107_v49, %v1106_v8  ;;  %v1114_v41 = vrot.slane %v1113_v37, 2  ;;  %v1578_v1 = vpop.eup %1577 }
  0xd3   :  { %v592_v19 = vmul.f32 %v528_v13, %v528_v13  ;;  %v591_v63 = vmul.f32 %v527_v14, %v527_v14  ;;  %v1203_v15 = vsel %vm1202_vm2, %v2195_v29, %v1201_v48  ;;  %v844_v5 = vand.u32 2147483648, %v2153_v30  ;;  %v152_v29 = vld [vmem:[%s2787_s2 + $0x148] sm:$0xff] }
  0xd4   :  { %v712_v28 = vadd.f32 %v711_v7, %v710_v57  ;;  %v353_v35 = vpop.permute.xlu1 %352  ;;  %v348_v36 = vpop.permute.xlu0 %347  ;;  %v721_v26 = vadd.f32 %v720_v31, %v719_v11  ;;  %v851_v61 = vand.u32 2147483648, %v2178_v62  ;;  %v1102_v38 = vrot.slane %v1101_v24, 1  ;;  %v151_v7 = vld [vmem:[%s2787_s2 + $0x140] sm:$0xff] }
  0xd5   :  { %v530_v25 = vsub.f32 %v353_v35, %v146_v12  ;;  %v729_v43 = vsel %vm623_vm0, %v592_v19, 0.0  ;;  %v728_v44 = vsel %vm623_vm0, %v591_v63, 0.0  ;;  %v529_v45 = vsub.f32 %v348_v36, %v145_v20 }
  0xd6   :  { %v713_v56 = vrot.slane %v712_v28, 1  ;;  %v722_v46 = vrot.slane %v721_v26, 4  ;;  %v730_v59 = vadd.f32 %v729_v43, %v728_v44  ;;  %1581 = vrsqrt.f32 %v2249_v51 }
  0xd7   :  { %v594_v50 = vmul.f32 %v530_v25, %v530_v25  ;;  %v593_v55 = vmul.f32 %v529_v45, %v529_v45  ;;  %v1096_v11 = vadd.f32 %v1095_v47, %v1094_v16  ;;  %v1109_v12 = vrot.slane %v1108_v34, 1 }
  0xd8   :  { %v363_v58 = vpop.permute.xlu1 %362  ;;  %v358_v17 = vpop.permute.xlu0 %357  ;;  %v723_v53 = vadd.f32 %v722_v46, %v721_v26  ;;  %v2251_v60 = vadd.f32 %v713_v56, %v712_v28  ;;  %v1115_v10 = vadd.f32 %v1114_v41, %v1113_v37  ;;  %v1205_v19 = vsel %vm1204_vm3, %v1089_v42, %v1203_v15  ;;  %v155_v56 = vld [vmem:[%s2787_s2 + $0x160] sm:$0xff]  ;;  %v153_v46 = vld [vmem:[%s2787_s2 + $0x150] sm:$0xff]  ;;  %v156_v42 = vld [vmem:[%s2787_s2 + $0x168] sm:$0xff] }
  0xd9   :  { %v731_v52 = vsel %vm623_vm0, %v593_v55, 0.0  ;;  %v532_v57 = vsub.f32 %v363_v58, %v148_v54  ;;  %v531_v4 = vsub.f32 %v358_v17, %v147_v27  ;;  %v733_v6 = vsel %vm623_vm0, %v594_v50, 0.0  ;;  %v2301_v27 = vld [vmem:[%s2788_s3 + $0x8] sm:$0xff] }
  0xda   :  { %v724_v39 = vrot.slane %v723_v53, 2  ;;  %v732_v2 = vadd.f32 %v731_v52, %v730_v59  ;;  %1583 = vrsqrt.f32 %v2251_v60  ;;  %v2270_v31 = vmul.f32 %v2208_v0, %v2153_v30  ;;  %v1580_v0 = vpop.eup %1579 }
  0xdb   :  { %v596_v21 = vmul.f32 %v532_v57, %v532_v57  ;;  %v595_v28 = vmul.f32 %v531_v4, %v531_v4  ;;  %v1103_v26 = vadd.f32 %v1102_v38, %v1101_v24  ;;  %v2274_v16 = vmul.f32 %v2223_v3, %v2178_v62  ;;  %v149_v3 = vld [vmem:[%s2787_s2 + $0x130] sm:$0xff] }
  0xdc   :  { %v383_v9 = vpop.permute.xlu1 %382  ;;  %v378_v8 = vpop.permute.xlu0 %377  ;;  %v725_v13 = vadd.f32 %v724_v39, %v723_v53  ;;  %v734_v14 = vadd.f32 %v733_v6, %v732_v2  ;;  %v858_v25 = vand.u32 2147483648, %v2220_v32  ;;  %v1207_v43 = vsel %vm1206_vm4, %v1096_v11, %v1205_v19 }
  0xdd   :  { %v536_v35 = vsub.f32 %v383_v9, %v152_v29  ;;  %v535_v36 = vsub.f32 %v378_v8, %v151_v7  ;;  %v2282_v44 = vmul.f32 %v1578_v1, %v2220_v32  ;;  %v865_v45 = vand.u32 2147483648, %v2233_v18  ;;  %v160_v1 = vld [vmem:[%s2787_s2 + $0x188] sm:$0xff] }
  0xde   :  { %v726_v63 = vrot.slane %v725_v13, 1  ;;  %v735_v20 = vrot.slane %v734_v14, 4  ;;  %v1110_v47 = vadd.f32 %v1109_v12, %v1108_v34  ;;  %v1116_v48 = vrot.slane %v1115_v10, 1 }
  0xdf   :  { %v742_v54 = vsel %vm623_vm0, %v596_v21, 0.0  ;;  %v741_v58 = vsel %vm623_vm0, %v595_v28, 0.0  ;;  %v600_v17 = vmul.f32 %v536_v35, %v536_v35  ;;  %v599_v24 = vmul.f32 %v535_v36, %v535_v36 }
  0xe0   :  { %v398_v49 = vpop.permute.xlu1 %397  ;;  %v368_v40 = vpop.permute.xlu0 %367  ;;  %v736_v37 = vadd.f32 %v735_v20, %v734_v14  ;;  %v2294_v50 = vadd.f32 %v726_v63, %v725_v13  ;;  %v1209_v34 = vsel %vm1208_vm5, %v1103_v26, %v1207_v43  ;;  %v2305_v57 = vmul.f32 %v1580_v0, %v2233_v18  ;;  %v159_v13 = vld [vmem:[%s2787_s2 + $0x180] sm:$0xff]  ;;  %v157_v0 = vld [vmem:[%s2787_s2 + $0x170] sm:$0xff] }
  0xe1   :  { %v539_v53 = vsub.f32 %v398_v49, %v155_v56  ;;  %v533_v15 = vsub.f32 %v368_v40, %v149_v3  ;;  %v872_v4 = vand.u32 2147483648, %v2249_v51  ;;  %v879_v6 = vand.u32 2147483648, %v2251_v60  ;;  %v1582_v8 = vpop.eup %1581  ;;  %v150_v56 = vld [vmem:[%s2787_s2 + $0x138] sm:$0xff] }
  0xe2   :  { %v737_v55 = vrot.slane %v736_v37, 2  ;;  %v1439_v9 = vrot.slane %v2301_v27, 1  ;;  %1585 = vrsqrt.f32 %v2294_v50  ;;  %v1117_v14 = vadd.f32 %v1116_v48, %v1115_v10 }
  0xe3   :  { %v1440_v29 = vrot.slane %v2301_v27, 2  ;;  %v743_v11 = vadd.f32 %v742_v54, %v741_v58  ;;  %v755_v12 = vsel %vm623_vm0, %v600_v17, 0.0  ;;  %v603_v19 = vmul.f32 %v539_v53, %v539_v53 }
  0xe4   :  { %v388_v59 = vpop.permute.xlu1 %387  ;;  %v403_v52 = vpop.permute.xlu0 %402  ;;  %v738_v41 = vadd.f32 %v737_v55, %v736_v37  ;;  %v1211_v21 = vsel %vm1210_vm6, %v1110_v47, %v1209_v34  ;;  %v754_v28 = vsel %vm623_vm0, %v599_v24, 0.0  ;;  %v597_v10 = vmul.f32 %v533_v15, %v533_v15 }
  0xe5   :  { %v537_v39 = vsub.f32 %v388_v59, %v153_v46  ;;  %v540_v2 = vsub.f32 %v403_v52, %v156_v42  ;;  %v1584_v7 = vpop.eup %1583  ;;  %v2328_v49 = vmul.f32 %v1582_v8, %v2249_v51  ;;  %v886_v43 = vand.u32 2147483648, %v2294_v50 }
  0xe6   :  { %v739_v38 = vrot.slane %v738_v41, 1  ;;  %v2340_v3 = vsel %vm2794_vm7, %v1117_v14, %v1211_v21  ;;  %v1441_v46 = vrot.slane %v2301_v27, 3  ;;  %v1442_v42 = vrot.slane %v2301_v27, 4 }
  0xe7   :  { %v601_v35 = vmul.f32 %v537_v39, %v537_v39  ;;  %v604_v36 = vmul.f32 %v540_v2, %v540_v2  ;;  %v2346_v47 = vmul.f32 %v1584_v7, %v2251_v60  ;;  %v756_v48 = vadd.f32 %v755_v12, %v754_v28  ;;  %v164_v2 = vld [vmem:[%s2787_s2 + $0x1a8] sm:$0xff]  ;;  %v163_v7 = vld [vmem:[%s2787_s2 + $0x1a0] sm:$0xff] }
  0xe8   :  { %v423_v63 = vpop.permute.xlu1 %422  ;;  %v418_v20 = vpop.permute.xlu0 %417  ;;  %v2330_v40 = vadd.f32 %v739_v38, %v738_v41  ;;  %v767_v55 = vsel %vm623_vm0, %v603_v19, 0.0  ;;  %v1443_v17 = vrot.slane %v2301_v27, 5  ;;  %v744_v24 = vsel %vm623_vm0, %v597_v10, 0.0 }
  0xe9   :  { %v544_v26 = vsub.f32 %v423_v63, %v160_v1  ;;  %v543_v37 = vsub.f32 %v418_v20, %v159_v13  ;;  %v757_v53 = vsel %vm623_vm0, %v601_v35, 0.0  ;;  %v768_v59 = vsel %vm623_vm0, %v604_v36, 0.0 }
  0xea   :  { %1587 = vrsqrt.f32 %v2330_v40  ;;  %vm855_vm10 = vcmp.eq.f32.partialorder %v2220_v32, inf  ;;  %v1444_v8 = vrot.slane %v2301_v27, 6  ;;  %v1445_v38 = vrot.slane %v2301_v27, 7 }
  0xeb   :  { %v608_v34 = vmul.f32 %v544_v26, %v544_v26  ;;  %v607_v41 = vmul.f32 %v543_v37, %v543_v37  ;;  %v833_v1 = vmul.f32 %v2199_v33, %v2150_v23  ;;  %v745_v13 = vadd.f32 %v744_v24, %v743_v11  ;;  %v154_v37 = vld [vmem:[%s2787_s2 + $0x158] sm:$0xff]  ;;  %v161_v24 = vld [vmem:[%s2787_s2 + $0x190] sm:$0xff] }
  0xec   :  { %v408_v54 = vpop.permute.xlu1 %407  ;;  %v373_v58 = vpop.permute.xlu0 %372  ;;  %v2367_v19 = vstv %s2318_s9  ;;  %v2370_v63 = vstv %s2322_s10  ;;  %v2373_v20 = vstv %s2324_s11  ;;  %vm862_vm11 = vcmp.eq.f32.partialorder %v2233_v18, inf }
  0xed   :  { %v534_v52 = vsub.f32 %v373_v58, %v150_v56  ;;  %v541_v15 = vsub.f32 %v408_v54, %v157_v0  ;;  %v1586_v21 = vpop.eup %1585  ;;  %vm869_vm12 = vcmp.eq.f32.partialorder %v2249_v51, inf  ;;  %v758_v28 = vadd.f32 %v757_v53, %v756_v48 }
  0xee   :  { %v769_v33 = vadd.f32 %v768_v59, %v767_v55  ;;  %vm834_vm13 = vcmp.eq.f32.partialorder %v2150_v23, inf  ;;  %v781_v10 = vsel %vm623_vm0, %v608_v34, 0.0  ;;  %v780_v35 = vsel %vm623_vm0, %v607_v41, 0.0 }
  0xef   :  { %v598_v39 = vmul.f32 %v534_v52, %v534_v52  ;;  %v605_v36 = vmul.f32 %v541_v15, %v541_v15  ;;  %v893_v54 = vand.u32 2147483648, %v2330_v40  ;;  %v835_v48 = vsel %vm834_vm13, %v2150_v23, %v833_v1 }
  0xf0   :  { %v443_v14 = vpop.permute.xlu1 %442  ;;  %v438_v12 = vpop.permute.xlu0 %437  ;;  %v2387_v55 = vmul.f32 %v1586_v21, %v2294_v50  ;;  %vm836_vm14 = vcmp.eq.f32.partialorder %v2150_v23, 0.0  ;;  %v837_v52 = vand.u32 2147483648, %v2150_v23  ;;  %v2394_v34 = vadd.f32 %v781_v10, %v780_v35 }
  0xf1   :  { %v746_v11 = vsel %vm623_vm0, %v598_v39, 0.0  ;;  %v548_v56 = vsub.f32 %v443_v14, %v164_v2  ;;  %v547_v0 = vsub.f32 %v438_v12, %v163_v7  ;;  %v842_v15 = vsel %vm841_vm8, %v2153_v30, %v2270_v31 }
  0xf2   :  { %v747_v26 = vadd.f32 %v746_v11, %v745_v13  ;;  %vm843_vm15 = vcmp.eq.f32.partialorder %v2153_v30, 0.0  ;;  %vm876_vm13 = vcmp.eq.f32.partialorder %v2251_v60, inf  ;;  %v770_v39 = vsel %vm623_vm0, %v605_v36, 0.0  ;;  %v167_v30 = vld [vmem:[%s2787_s2 + $0x1c0] sm:$0xff] }
  0xf3   :  { %vm890_vm7 = vcmp.eq.f32.partialorder %v2330_v40, inf  ;;  %v2404_v1 = vsel %vm836_vm14, %v837_v52, %v835_v48  ;;  %v849_v23 = vsel %vm848_vm9, %v2178_v62, %v2274_v16  ;;  %v612_v13 = vmul.f32 %v548_v56, %v548_v56 }
  0xf4   :  { %v748_v58 = vrot.slane %v747_v26, 4  ;;  %v428_v53 = vpop.permute.xlu1 %427  ;;  %v393_v59 = vpop.permute.xlu0 %392  ;;  %v611_v14 = vmul.f32 %v547_v0, %v547_v0  ;;  %v2412_v35 = vsel %vm843_vm15, %v844_v5, %v842_v15  ;;  %vm850_vm8 = vcmp.eq.f32.partialorder %v2178_v62, 0.0 }
  0xf5   :  { %v538_v41 = vsub.f32 %v393_v59, %v154_v37  ;;  %v545_v7 = vsub.f32 %v428_v53, %v161_v24  ;;  %v1588_v12 = vpop.eup %1587  ;;  %v856_v36 = vsel %vm855_vm10, %v2220_v32, %v2282_v44  ;;  %vm883_vm9 = vcmp.eq.f32.partialorder %v2294_v50, inf  ;;  %v168_v37 = vld [vmem:[%s2787_s2 + $0x1c8] sm:$0xff] }
  0xf6   :  { %v749_v2 = vadd.f32 %v748_v58, %v747_v26  ;;  %v771_v16 = vadd.f32 %v770_v39, %v769_v33  ;;  %v2429_v5 = vsel %vm850_vm8, %v851_v61, %v849_v23  ;;  %vm857_vm14 = vcmp.eq.f32.partialorder %v2220_v32, 0.0  ;;  %v158_v33 = vld [vmem:[%s2787_s2 + $0x178] sm:$0xff] }
  0xf7   :  { %v602_v31 = vmul.f32 %v538_v41, %v538_v41  ;;  %vm892_vm10 = vcmp.eq.f32.partialorder %v2330_v40, 0.0  ;;  %v863_v0 = vsel %vm862_vm11, %v2233_v18, %v2305_v57  ;;  %v870_v62 = vsel %vm869_vm12, %v2249_v51, %v2328_v49  ;;  %v165_v57 = vld [vmem:[%s2787_s2 + $0x1b0] sm:$0xff] }
  0xf8   :  { %v750_v21 = vrot.slane %v749_v2, 2  ;;  %v463_v11 = vpop.permute.xlu1 %462  ;;  %v458_v10 = vpop.permute.xlu0 %457  ;;  %v889_v61 = vmul.f32 %v1588_v12, %v2330_v40  ;;  %v793_v48 = vsel %vm623_vm0, %v611_v14, 0.0  ;;  %v609_v58 = vmul.f32 %v545_v7, %v545_v7  ;;  %v172_v14 = vld [vmem:[%s2787_s2 + $0x1e8] sm:$0xff] }
  0xf9   :  { %v759_v26 = vsel %vm623_vm0, %v602_v31, 0.0  ;;  %v552_v59 = vsub.f32 %v463_v11, %v168_v37  ;;  %v551_v52 = vsub.f32 %v458_v10, %v167_v30  ;;  %v2454_v49 = vsel %vm857_vm14, %v858_v25, %v856_v36  ;;  %v171_v25 = vld [vmem:[%s2787_s2 + $0x1e0] sm:$0xff] }
  0xfa   :  { %v751_v44 = vadd.f32 %v750_v21, %v749_v2  ;;  %v760_v56 = vadd.f32 %v759_v26, %v758_v28  ;;  %v794_v28 = vsel %vm623_vm0, %v612_v13, 0.0  ;;  %vm864_vm11 = vcmp.eq.f32.partialorder %v2233_v18, 0.0 }
  0xfb   :  { %vm871_vm12 = vcmp.eq.f32.partialorder %v2249_v51, 0.0  ;;  %v2460_v23 = vadd.f32 %v794_v28, %v793_v48  ;;  %v2467_v7 = vsel %vm864_vm11, %v865_v45, %v863_v0  ;;  %v891_v31 = vsel %vm890_vm7, %v2330_v40, %v889_v61  ;;  %v2508_v61 = vld [vmem:[%s2788_s3] sm:$0xff]  ;;  %v169_v40 = vld [vmem:[%s2787_s2 + $0x1d0] sm:$0xff] }
  0xfc   :  { %v752_v24 = vrot.slane %v751_v44, 1  ;;  %v761_v53 = vrot.slane %v760_v56, 4  ;;  %v448_v41 = vpop.permute.xlu1 %447  ;;  %v413_v15 = vpop.permute.xlu0 %412  ;;  %v2477_v12 = vsel %vm871_vm12, %v872_v4, %v870_v62  ;;  %v877_v18 = vsel %vm876_vm13, %v2251_v60, %v2346_v47 }
  0xfd   :  { %v542_v39 = vsub.f32 %v413_v15, %v158_v33  ;;  %v783_v45 = vsel %vm623_vm0, %v609_v58, 0.0  ;;  %v616_v21 = vmul.f32 %v552_v59, %v552_v59  ;;  %v615_v11 = vmul.f32 %v551_v52, %v551_v52 }
  0xfe   :  { %v2458_v2 = vadd.f32 %v752_v24, %v751_v44  ;;  %v762_v13 = vadd.f32 %v761_v53, %v760_v56  ;;  %v549_v10 = vsub.f32 %v448_v41, %v165_v57  ;;  %v162_v56 = vld [vmem:[%s2787_s2 + $0x198] sm:$0xff]  ;;  %vm878_vm7 = vcmp.eq.f32.partialorder %v2251_v60, 0.0 }
  0xff   :  { %v606_v32 = vmul.f32 %v542_v39, %v542_v39  ;;  %v884_v47 = vsel %vm883_vm9, %v2294_v50, %v2387_v55  ;;  %v784_v33 = vadd.f32 %v783_v45, %v2394_v34  ;;  %v2503_v62 = vsel %vm878_vm7, %v879_v6, %v877_v18 }
 0x100   :  { %v483_v36 = vpop.permute.xlu1 %482  ;;  %v478_v26 = vpop.permute.xlu0 %477  ;;  %1589 = vrsqrt.f32 %v2458_v2  ;;  %v763_v37 = vrot.slane %v762_v13, 2  ;;  %v807_v55 = vsel %vm623_vm0, %v616_v21, 0.0  ;;  %v806_v34 = vsel %vm623_vm0, %v615_v11, 0.0 }
 0x101   :  { %v772_v30 = vsel %vm623_vm0, %v606_v32, 0.0  ;;  %v556_v51 = vsub.f32 %v483_v36, %v172_v14  ;;  %v555_v44 = vsub.f32 %v478_v26, %v171_v25  ;;  %vm885_vm15 = vcmp.eq.f32.partialorder %v2294_v50, 0.0  ;;  %v173_v14 = vld [vmem:[%s2787_s2 + $0x1f0] sm:$0xff] }
 0x102   :  { %v773_v4 = vadd.f32 %v772_v30, %v771_v16  ;;  %v764_v0 = vadd.f32 %v763_v37, %v762_v13  ;;  %v2499_v16 = vsel %vm892_vm10, %v893_v54, %v891_v31  ;;  %v613_v6 = vmul.f32 %v549_v10, %v549_v10  ;;  %v166_v31 = vld [vmem:[%s2787_s2 + $0x1b8] sm:$0xff] }
 0x103   :  { %v620_v58 = vmul.f32 %v556_v51, %v556_v51  ;;  %v619_v59 = vmul.f32 %v555_v44, %v555_v44  ;;  %v2518_v52 = vsel %vm885_vm15, %v886_v43, %v884_v47  ;;  %v1432_v41 = vrot.slane %v2508_v61, 1  ;;  %v174_v30 = vld [vmem:[%s2787_s2 + $0x1f8] sm:$0xff] }
 0x104   :  { %v774_v28 = vrot.slane %v773_v4, 4  ;;  %v468_v54 = vpop.permute.xlu1 %467  ;;  %v433_v48 = vpop.permute.xlu0 %432  ;;  %v765_v60 = vrot.slane %v764_v0, 1  ;;  %v808_v57 = vadd.f32 %v807_v55, %v806_v34  ;;  %v1433_v43 = vrot.slane %v2508_v61, 2 }
 0x105   :  { %v546_v24 = vsub.f32 %v433_v48, %v162_v56  ;;  %v553_v39 = vsub.f32 %v468_v54, %v169_v40  ;;  %vm897_vm13 = vcmp.eq.f32.partialorder %v2458_v2, inf  ;;  %v796_v21 = vsel %vm623_vm0, %v613_v6, 0.0 }
 0x106   :  { %v775_v53 = vadd.f32 %v774_v28, %v773_v4  ;;  %v2521_v15 = vadd.f32 %v765_v60, %v764_v0  ;;  %v820_v11 = vsel %vm623_vm0, %v620_v58, 0.0  ;;  %v819_v36 = vsel %vm623_vm0, %v619_v59, 0.0  ;;  %v170_v0 = vld [vmem:[%s2787_s2 + $0x1d8] sm:$0xff] }
 0x107   :  { %v610_v13 = vmul.f32 %v546_v24, %v546_v24  ;;  %v900_v4 = vand.u32 2147483648, %v2458_v2  ;;  %v617_v44 = vmul.f32 %v553_v39, %v553_v39  ;;  %vm899_vm8 = vcmp.eq.f32.partialorder %v2458_v2, 0.0 }
 0x108   :  { %v776_v32 = vrot.slane %v775_v53, 2  ;;  %v488_v25 = vpop.permute.xlu1 %487  ;;  %v453_v50 = vpop.permute.xlu0 %452  ;;  %1591 = vrsqrt.f32 %v2521_v15  ;;  %v797_v55 = vadd.f32 %v796_v21, %v2460_v23  ;;  %v821_v60 = vadd.f32 %v820_v11, %v819_v36 }
 0x109   :  { %v785_v26 = vsel %vm623_vm0, %v610_v13, 0.0  ;;  %v557_v37 = vsub.f32 %v488_v25, %v173_v14  ;;  %v550_v47 = vsub.f32 %v453_v50, %v166_v31  ;;  %v809_v13 = vsel %vm623_vm0, %v617_v44, 0.0 }
 0x10a   :  { %v777_v10 = vadd.f32 %v776_v32, %v775_v53  ;;  %v1590_v51 = vpop.eup %1589  ;;  %v786_v56 = vadd.f32 %v785_v26, %v784_v33  ;;  %vm904_vm9 = vcmp.eq.f32.partialorder %v2521_v15, inf  ;;  %vm906_vm14 = vcmp.eq.f32.partialorder %v2521_v15, 0.0 }
 0x10b   :  { %v621_v28 = vmul.f32 %v557_v37, %v557_v37  ;;  %v614_v58 = vmul.f32 %v550_v47, %v550_v47  ;;  %v896_v33 = vmul.f32 %v1590_v51, %v2458_v2  ;;  %v810_v37 = vadd.f32 %v809_v13, %v808_v57 }
 0x10c   :  { %v778_v34 = vrot.slane %v777_v10, 1  ;;  %v493_v40 = vpop.permute.xlu1 %492  ;;  %v473_v54 = vpop.permute.xlu0 %472  ;;  %v787_v6 = vrot.slane %v786_v56, 4 }
 0x10d   :  { %v558_v24 = vsub.f32 %v493_v40, %v174_v30  ;;  %v822_v59 = vsel %vm623_vm0, %v621_v28, 0.0  ;;  %v554_v39 = vsub.f32 %v473_v54, %v170_v0  ;;  %v798_v14 = vsel %vm623_vm0, %v614_v58, 0.0 }
 0x10e   :  { %v2549_v53 = vadd.f32 %v778_v34, %v777_v10  ;;  %v788_v23 = vadd.f32 %v787_v6, %v786_v56  ;;  %v823_v25 = vadd.f32 %v822_v59, %v821_v60  ;;  %v799_v11 = vadd.f32 %v798_v14, %v797_v55 }
 0x10f   :  { %v622_v32 = vmul.f32 %v558_v24, %v558_v24  ;;  %v618_v36 = vmul.f32 %v554_v39, %v554_v39  ;;  %v898_v26 = vsel %vm897_vm13, %v2458_v2, %v896_v33  ;;  %v907_v34 = vand.u32 2147483648, %v2521_v15 }
 0x110   :  { %1593 = vrsqrt.f32 %v2549_v53  ;;  %v1182_v31 = vpop.permute.xlu1 %1181  ;;  %v789_v21 = vrot.slane %v788_v23, 2  ;;  %v800_v56 = vrot.slane %v799_v11, 4  ;;  %vm911_vm10 = vcmp.eq.f32.partialorder %v2549_v53, inf  ;;  %v1177_v57 = vpop.permute.xlu0 %1176 }
 0x111   :  { %v824_v10 = vsel %vm623_vm0, %v622_v32, 0.0  ;;  %v811_v47 = vsel %vm623_vm0, %v618_v36, 0.0  ;;  %v2564_v0 = vmul.f32 %v2112_v22, %v1182_v31  ;;  %v901_v6 = vsel %vm899_vm8, %v900_v4, %v898_v26 }
 0x112   :  { %v825_v30 = vadd.f32 %v824_v10, %v823_v25  ;;  %v1592_v51 = vpop.eup %1591  ;;  %v790_v44 = vadd.f32 %v789_v21, %v788_v23  ;;  %v812_v40 = vadd.f32 %v811_v47, %v810_v37  ;;  %v801_v60 = vadd.f32 %v800_v56, %v799_v11 }
 0x113   :  { %v903_v55 = vmul.f32 %v1592_v51, %v2521_v15  ;;  %vm913_vm11 = vcmp.eq.f32.partialorder %v2549_v53, 0.0  ;;  %v914_v33 = vand.u32 2147483648, %v2549_v53  ;;  %v1234_v13 = vrot.slane %v2564_v0, 1 }
 0x114   :  { %v826_v28 = vrot.slane %v825_v30, 4  ;;  %v791_v54 = vrot.slane %v790_v44, 1  ;;  %v813_v24 = vrot.slane %v812_v40, 4  ;;  %v802_v39 = vrot.slane %v801_v60, 2 }
 0x115   :  { %v905_v58 = vsel %vm904_vm9, %v2521_v15, %v903_v55  ;;  %v2580_v2 = vmul.f32 %v2340_v3, %v1177_v57  ;;  %v1235_v32 = vrot.slane %v2564_v0, 2  ;;  %v1236_v25 = vrot.slane %v2564_v0, 3 }
 0x116   :  { %v827_v22 = vadd.f32 %v826_v28, %v825_v30  ;;  %v2576_v59 = vadd.f32 %v791_v54, %v790_v44  ;;  %v814_v14 = vadd.f32 %v813_v24, %v812_v40  ;;  %v908_v4 = vsel %vm906_vm14, %v907_v34, %v905_v58  ;;  %v2596_v34 = vpop.permute.xlu1 %1380 }
 0x117   :  { %v1237_v31 = vrot.slane %v2564_v0, 4  ;;  %v803_v11 = vadd.f32 %v802_v39, %v801_v60  ;;  %v1265_v26 = vsub.f32 %v2499_v16, %v2564_v0  ;;  %v1238_v15 = vrot.slane %v2564_v0, 5 }
 0x118   :  { %v828_v23 = vrot.slane %v827_v22, 2  ;;  %1595 = vrsqrt.f32 %v2576_v59  ;;  %v815_v36 = vrot.slane %v814_v14, 2  ;;  %v1266_v37 = vsub.f32 %v901_v6, %v1234_v13 }
 0x119   :  { %v1267_v30 = vsub.f32 %v908_v4, %v1235_v32  ;;  %v804_v51 = vrot.slane %v803_v11, 1  ;;  %v1239_v47 = vrot.slane %v2564_v0, 6  ;;  %v1281_v28 = vmax.f32 %v1265_v26, 0.0 }
 0x11a   :  { %v1594_v21 = vpop.eup %1593  ;;  %v829_v10 = vadd.f32 %v828_v23, %v827_v22  ;;  %v816_v56 = vadd.f32 %v815_v36, %v814_v14  ;;  %v1282_v40 = vmax.f32 %v1266_v37, 0.0  ;;  %vm918_vm12 = vcmp.eq.f32.partialorder %v2576_v59, inf }
 0x11b   :  { %v910_v3 = vmul.f32 %v1594_v21, %v2549_v53  ;;  %v1283_v16 = vmax.f32 %v1267_v30, 0.0  ;;  %v2598_v54 = vadd.f32 %v804_v51, %v803_v11  ;;  %vm920_vm7 = vcmp.eq.f32.partialorder %v2576_v59, 0.0 }
 0x11c   :  { %v830_v44 = vrot.slane %v829_v10, 1  ;;  %v817_v57 = vrot.slane %v816_v56, 1  ;;  %v1240_v58 = vrot.slane %v2564_v0, 7  ;;  %v921_v24 = vand.u32 2147483648, %v2576_v59 }
 0x11d   :  { %v912_v55 = vsel %vm911_vm10, %v2549_v53, %v910_v3  ;;  %1597 = vrsqrt.f32 %v2598_v54  ;;  %v1389_v39 = vrot.slane %v2596_v34, 1  ;;  %v1390_v13 = vrot.slane %v2596_v34, 2 }
 0x11e   :  { %v2600_v60 = vadd.f32 %v830_v44, %v829_v10  ;;  %v915_v6 = vsel %vm913_vm11, %v914_v33, %v912_v55  ;;  %v1298_v53 = vmul.f32 %v2367_v19, %v1281_v28  ;;  %v1299_v33 = vmul.f32 %v2367_v19, %v1282_v40 }
 0x11f   :  { %v1268_v22 = vsub.f32 %v915_v6, %v1236_v25  ;;  %v1300_v23 = vmul.f32 %v2367_v19, %v1283_v16  ;;  %v2615_v14 = vadd.f32 %v817_v57, %v816_v56  ;;  %v1314_v32 = vmul.f32 %v1281_v28, %v1281_v28 }
 0x120   :  { %1599 = vrsqrt.f32 %v2600_v60  ;;  %v1315_v25 = vmul.f32 %v1282_v40, %v1282_v40  ;;  %v928_v11 = vand.u32 2147483648, %v2598_v54  ;;  %v942_v10 = vand.u32 2147483648, %v2600_v60 }
 0x121   :  { %v1284_v4 = vmax.f32 %v1268_v22, 0.0  ;;  %v1316_v36 = vmul.f32 %v1283_v16, %v1283_v16  ;;  %v1391_v26 = vrot.slane %v2596_v34, 3  ;;  %vm925_vm15 = vcmp.eq.f32.partialorder %v2598_v54, inf }
 0x122   :  { %v1596_v21 = vpop.eup %1595  ;;  %1601 = vrsqrt.f32 %v2615_v14  ;;  %v1392_v37 = vrot.slane %v2596_v34, 4  ;;  %v1393_v30 = vrot.slane %v2596_v34, 5  ;;  %vm927_vm13 = vcmp.eq.f32.partialorder %v2598_v54, 0.0 }
 0x123   :  { %v917_v3 = vmul.f32 %v1596_v21, %v2576_v59  ;;  %vm939_vm8 = vcmp.eq.f32.partialorder %v2600_v60, inf  ;;  %v935_v51 = vand.u32 2147483648, %v2615_v14  ;;  %v1301_v44 = vmul.f32 %v2367_v19, %v1284_v4 }
 0x124   :  { %v1317_v56 = vmul.f32 %v1284_v4, %v1284_v4  ;;  %v1331_v55 = vmul.f32 %v2370_v63, %v1314_v32  ;;  %vm941_vm9 = vcmp.eq.f32.partialorder %v2600_v60, 0.0  ;;  %v1332_v40 = vmul.f32 %v2370_v63, %v1315_v25 }
 0x125   :  { %v919_v28 = vsel %vm918_vm12, %v2576_v59, %v917_v3  ;;  %v1333_v16 = vmul.f32 %v2370_v63, %v1316_v36  ;;  %v1394_v57 = vrot.slane %v2596_v34, 6  ;;  %v1395_v32 = vrot.slane %v2596_v34, 7 }
 0x126   :  { %v922_v6 = vsel %vm920_vm7, %v921_v24, %v919_v28  ;;  %v1334_v22 = vmul.f32 %v2370_v63, %v1317_v56  ;;  %v1347_v4 = vadd.f32 %v1331_v55, %v1298_v53  ;;  %vm932_vm14 = vcmp.eq.f32.partialorder %v2615_v14, inf }
 0x127   :  { %v1269_v21 = vsub.f32 %v922_v6, %v1237_v31  ;;  %v1348_v3 = vadd.f32 %v1332_v40, %v1299_v33  ;;  %v1349_v50 = vadd.f32 %v1333_v16, %v1300_v23  ;;  %v1227_v25 = vrot.slane %v2580_v2, 1  ;;  %v1598_v56 = vpop.eup %1597 }
 0x128   :  { %vm934_vm10 = vcmp.eq.f32.partialorder %v2615_v14, 0.0  ;;  %v1350_v36 = vadd.f32 %v1334_v22, %v1301_v44  ;;  %v1364_v59 = vadd.f32 %v2373_v20, %v1347_v4  ;;  %v1228_v24 = vrot.slane %v2580_v2, 2 }
 0x129   :  { %v1229_v53 = vrot.slane %v2580_v2, 3  ;;  %v1285_v55 = vmax.f32 %v1269_v21, 0.0  ;;  %v1365_v28 = vadd.f32 %v2373_v20, %v1348_v3  ;;  %v1366_v48 = vadd.f32 %v2373_v20, %v1349_v50 }
 0x12a   :  { %v1230_v31 = vrot.slane %v2580_v2, 4  ;;  %v1600_v33 = vpop.eup %1599  ;;  %v924_v23 = vmul.f32 %v1598_v56, %v2598_v54  ;;  %v1367_v40 = vadd.f32 %v2373_v20, %v1350_v36  ;;  %v1420_v44 = vadd.f32 %v2596_v34, %v1364_v59 }
 0x12b   :  { %v1231_v16 = vrot.slane %v2580_v2, 5  ;;  %v938_v6 = vmul.f32 %v1600_v33, %v2600_v60  ;;  %v1302_v22 = vmul.f32 %v2367_v19, %v1285_v55  ;;  %v1318_v4 = vmul.f32 %v1285_v55, %v1285_v55 }
 0x12c   :  { %v1421_v21 = vadd.f32 %v1389_v39, %v1365_v28  ;;  %v926_v50 = vsel %vm925_vm15, %v2598_v54, %v924_v23  ;;  %v1422_v3 = vadd.f32 %v1390_v13, %v1366_v48  ;;  %v1423_v45 = vadd.f32 %v1391_v26, %v1367_v40  ;;  %v1602_v18 = vpop.eup %1601 }
 0x12d   :  { %v1470_v56 = vadd.f32 %v2301_v27, %v1420_v44  ;;  %v940_v36 = vsel %vm939_vm8, %v2600_v60, %v938_v6  ;;  %v929_v59 = vsel %vm927_vm13, %v928_v11, %v926_v50  ;;  %v1335_v33 = vmul.f32 %v2370_v63, %v1318_v4 }
 0x12e   :  { %v1471_v39 = vadd.f32 %v1439_v9, %v1421_v21  ;;  %v931_v55 = vmul.f32 %v1602_v18, %v2615_v14  ;;  %v943_v48 = vsel %vm941_vm9, %v942_v10, %v940_v36  ;;  %v1270_v13 = vsub.f32 %v929_v59, %v1238_v15 }
 0x12f   :  { %v1472_v26 = vadd.f32 %v1440_v29, %v1422_v3  ;;  %v1272_v54 = vsub.f32 %v943_v48, %v1240_v58  ;;  %v1351_v11 = vadd.f32 %v1335_v33, %v1302_v22  ;;  %v1473_v28 = vadd.f32 %v1441_v46, %v1423_v45 }
 0x130   :  { %v1508_v23 = vrot.slane %v1471_v39, 7  ;;  %v933_v9 = vsel %vm932_vm14, %v2615_v14, %v931_v55  ;;  %v1286_v18 = vmax.f32 %v1270_v13, 0.0  ;;  %v1232_v10 = vrot.slane %v2580_v2, 6 }
 0x131   :  { %v1510_v60 = vrot.slane %v1472_v26, 6  ;;  %v936_v15 = vsel %vm934_vm10, %v935_v51, %v933_v9  ;;  %v1288_v29 = vmax.f32 %v1272_v54, 0.0  ;;  %v1368_v40 = vadd.f32 %v2373_v20, %v1351_v11 }
 0x132   :  { %v1509_v58 = vsel %vm1200_vm1, %v1508_v23, %v1470_v56  ;;  %v1271_v46 = vsub.f32 %v936_v15, %v1239_v47  ;;  %v1303_v45 = vmul.f32 %v2367_v19, %v1286_v18  ;;  %v1319_v44 = vmul.f32 %v1286_v18, %v1286_v18 }
 0x133   :  { %v1511_v6 = vsel %vm1202_vm2, %v1510_v60, %v1509_v58  ;;  %v1305_v22 = vmul.f32 %v2367_v19, %v1288_v29  ;;  %v1321_v4 = vmul.f32 %v1288_v29, %v1288_v29  ;;  %v1424_v14 = vadd.f32 %v1392_v37, %v1368_v40 }
 0x134   :  { %v1512_v51 = vrot.slane %v1473_v28, 5  ;;  %v1287_v21 = vmax.f32 %v1271_v46, 0.0  ;;  %v1336_v50 = vmul.f32 %v2370_v63, %v1319_v44  ;;  %v1233_v3 = vrot.slane %v2580_v2, 7 }
 0x135   :  { %v1257_v0 = vsub.f32 %v2404_v1, %v2580_v2  ;;  %v1338_v47 = vmul.f32 %v2370_v63, %v1321_v4  ;;  %v1474_v56 = vadd.f32 %v1442_v42, %v1424_v14  ;;  %v1258_v59 = vsub.f32 %v2412_v35, %v1227_v25 }
 0x136   :  { %v1513_v36 = vsel %vm1204_vm3, %v1512_v51, %v1511_v6  ;;  %v1304_v37 = vmul.f32 %v2367_v19, %v1287_v21  ;;  %v1320_v33 = vmul.f32 %v1287_v21, %v1287_v21  ;;  %v1352_v39 = vadd.f32 %v1336_v50, %v1303_v45 }
 0x137   :  { %v1259_v55 = vsub.f32 %v2429_v5, %v1228_v24  ;;  %v1354_v48 = vadd.f32 %v1338_v47, %v1305_v22  ;;  %v1514_v13 = vrot.slane %v1474_v56, 4  ;;  %v1260_v26 = vsub.f32 %v2454_v49, %v1229_v53 }
 0x138   :  { %v1261_v1 = vsub.f32 %v2467_v7, %v1230_v31  ;;  %v1337_v2 = vmul.f32 %v2370_v63, %v1320_v33  ;;  %v1369_v42 = vadd.f32 %v2373_v20, %v1352_v39  ;;  %v1262_v54 = vsub.f32 %v2477_v12, %v1231_v16 }
 0x139   :  { %v1263_v35 = vsub.f32 %v2503_v62, %v1232_v10  ;;  %v1371_v25 = vadd.f32 %v2373_v20, %v1354_v48  ;;  %v1515_v11 = vsel %vm1206_vm4, %v1514_v13, %v1513_v36  ;;  %v1264_v5 = vsub.f32 %v2518_v52, %v1233_v3  ;;  %v1377_v13 = vpop.permute.xlu0 %1376 }
 0x13a   :  { %v1273_v24 = vmax.f32 %v1257_v0, 0.0  ;;  %v1353_v28 = vadd.f32 %v1337_v2, %v1304_v37  ;;  %v1425_v49 = vadd.f32 %v1393_v30, %v1369_v42  ;;  %v1274_v7 = vmax.f32 %v1258_v59, 0.0 }
 0x13b   :  { %v1275_v53 = vmax.f32 %v1259_v55, 0.0  ;;  %v1427_v31 = vadd.f32 %v1395_v32, %v1371_v25  ;;  %v1276_v23 = vmax.f32 %v1260_v26, 0.0  ;;  %v1277_v12 = vmax.f32 %v1261_v1, 0.0 }
 0x13c   :  { %v1278_v16 = vmax.f32 %v1262_v54, 0.0  ;;  %v1370_v62 = vadd.f32 %v2373_v20, %v1353_v28  ;;  %v1475_v9 = vadd.f32 %v1443_v17, %v1425_v49  ;;  %v1279_v18 = vmax.f32 %v1263_v35, 0.0 }
 0x13d   :  { %v1280_v52 = vmax.f32 %v1264_v5, 0.0  ;;  %v1477_v60 = vadd.f32 %v1445_v38, %v1427_v31  ;;  %v1290_v30 = vmul.f32 %v2367_v19, %v1273_v24  ;;  %v1291_v10 = vmul.f32 %v2367_v19, %v1274_v7 }
 0x13e   :  { %v1292_v15 = vmul.f32 %v2367_v19, %v1275_v53  ;;  %v1426_v32 = vadd.f32 %v1394_v57, %v1370_v62  ;;  %v1516_v29 = vrot.slane %v1475_v9, 3  ;;  %v1293_v40 = vmul.f32 %v2367_v19, %v1276_v23 }
 0x13f   :  { %v1294_v58 = vmul.f32 %v2367_v19, %v1277_v12  ;;  %v1520_v17 = vrot.slane %v1477_v60, 1  ;;  %v1295_v46 = vmul.f32 %v2367_v19, %v1278_v16  ;;  %v1296_v45 = vmul.f32 %v2367_v19, %v1279_v18 }
 0x140   :  { %v1297_v38 = vmul.f32 %v2367_v19, %v1280_v52  ;;  %v1476_v44 = vadd.f32 %v1444_v8, %v1426_v32  ;;  %v1517_v6 = vsel %vm1208_vm5, %v1516_v29, %v1515_v11  ;;  %v1306_v22 = vmul.f32 %v1273_v24, %v1273_v24 }
 0x141   :  { %v1307_v34 = vmul.f32 %v1274_v7, %v1274_v7  ;;  %v1308_v57 = vmul.f32 %v1275_v53, %v1275_v53  ;;  %v1309_v4 = vmul.f32 %v1276_v23, %v1276_v23  ;;  %v1310_v14 = vmul.f32 %v1277_v12, %v1277_v12 }
 0x142   :  { %v1311_v51 = vmul.f32 %v1278_v16, %v1278_v16  ;;  %v1518_v21 = vrot.slane %v1476_v44, 2  ;;  %v1312_v50 = vmul.f32 %v1279_v18, %v1279_v18  ;;  %v1313_v3 = vmul.f32 %v1280_v52, %v1280_v52 }
 0x143   :  { %v1323_v0 = vmul.f32 %v2370_v63, %v1306_v22  ;;  %v1324_v47 = vmul.f32 %v2370_v63, %v1307_v34  ;;  %v1325_v19 = vmul.f32 %v2370_v63, %v1308_v57  ;;  %v1326_v27 = vmul.f32 %v2370_v63, %v1309_v4 }
 0x144   :  { %v1327_v8 = vmul.f32 %v2370_v63, %v1310_v14  ;;  %v1519_v56 = vsel %vm1210_vm6, %v1518_v21, %v1517_v6  ;;  %v1328_v36 = vmul.f32 %v2370_v63, %v1311_v51  ;;  %v1329_v59 = vmul.f32 %v2370_v63, %v1312_v50 }
 0x145   :  { %v1330_v37 = vmul.f32 %v2370_v63, %v1313_v3  ;;  %vm2795_vm11 = vcmask 1047559   ;;  %v1339_v39 = vadd.f32 %v1323_v0, %v1290_v30  ;;  %v1340_v55 = vadd.f32 %v1324_v47, %v1291_v10 }
 0x146   :  { %v1521_v33 = vsel %vm2795_vm11, %v1520_v17, %v1519_v56  ;;  %v1341_v48 = vadd.f32 %v1325_v19, %v1292_v15  ;;  %v1342_v26 = vadd.f32 %v1326_v27, %v1293_v40  ;;  %v1343_v1 = vadd.f32 %v1327_v8, %v1294_v58  ;;  %vm2800_vm12 = vmmov %vm2795_vm11 }
 0x147   :  { %1525 = vst.msk [vmem:[%s2793_s8 + $0x8] sm:$0xff] %vm623_vm0, %v1521_v33  ;;  %v1344_v2 = vadd.f32 %v1328_v36, %v1295_v46  ;;  %v1345_v42 = vadd.f32 %v1329_v59, %v1296_v45  ;;  %v1346_v54 = vadd.f32 %v1330_v37, %v1297_v38  ;;  %v1356_v35 = vadd.f32 %v2373_v20, %v1339_v39 }
 0x148   :  { %v1357_v63 = vadd.f32 %v2373_v20, %v1340_v55  ;;  %v1358_v25 = vadd.f32 %v2373_v20, %v1341_v48  ;;  %v1359_v11 = vadd.f32 %v2373_v20, %v1342_v26  ;;  %v1360_v5 = vadd.f32 %v2373_v20, %v1343_v1 }
 0x149   :  { %v1361_v24 = vadd.f32 %v2373_v20, %v1344_v2  ;;  %v1362_v28 = vadd.f32 %v2373_v20, %v1345_v42  ;;  %v1363_v49 = vadd.f32 %v2373_v20, %v1346_v54  ;;  %v1382_v7 = vrot.slane %v1377_v13, 1 }
 0x14a   :  { %v1383_v53 = vrot.slane %v1377_v13, 2  ;;  %v1384_v31 = vrot.slane %v1377_v13, 3  ;;  %v1385_v23 = vrot.slane %v1377_v13, 4  ;;  %v1386_v12 = vrot.slane %v1377_v13, 5 }
 0x14b   :  { %v1387_v16 = vrot.slane %v1377_v13, 6  ;;  %v1388_v62 = vrot.slane %v1377_v13, 7  ;;  %v1412_v9 = vadd.f32 %v1377_v13, %v1356_v35  ;;  %v1413_v18 = vadd.f32 %v1382_v7, %v1357_v63 }
 0x14c   :  { %v1414_v52 = vadd.f32 %v1383_v53, %v1358_v25  ;;  %v1415_v60 = vadd.f32 %v1384_v31, %v1359_v11  ;;  %v1438_v30 = vrot.slane %v2508_v61, 7  ;;  %v1416_v10 = vadd.f32 %v1385_v23, %v1360_v5 }
 0x14d   :  { %v1417_v15 = vadd.f32 %v1386_v12, %v1361_v24  ;;  %v1418_v32 = vadd.f32 %v1387_v16, %v1362_v28  ;;  %v1419_v29 = vadd.f32 %v1388_v62, %v1363_v49  ;;  %v1463_v20 = vadd.f32 %v1432_v41, %v1413_v18 }
 0x14e   :  { %v1464_v40 = vadd.f32 %v1433_v43, %v1414_v52  ;;  %v2796_v58 = vrot.slane %v2508_v61, 3  ;;  %v2797_v46 = vrot.slane %v2508_v61, 4  ;;  %v1462_v38 = vadd.f32 %v2508_v61, %v1412_v9 }
 0x14f   :  { %v2798_v44 = vrot.slane %v2508_v61, 5  ;;  %v1494_v22 = vrot.slane %v1463_v20, 7  ;;  %v2799_v57 = vrot.slane %v2508_v61, 6  ;;  %v1469_v41 = vadd.f32 %v1438_v30, %v1419_v29 }
 0x150   :  { %v1465_v17 = vadd.f32 %v2796_v58, %v1415_v60  ;;  %v1466_v45 = vadd.f32 %v2797_v46, %v1416_v10  ;;  %v1496_v34 = vrot.slane %v1464_v40, 6 }
 0x151   :  { %v1467_v6 = vadd.f32 %v2798_v44, %v1417_v15  ;;  %v1468_v4 = vadd.f32 %v2799_v57, %v1418_v32  ;;  %v1495_v14 = vsel %vm1200_vm1, %v1494_v22, %v1462_v38  ;;  %v1506_v27 = vrot.slane %v1469_v41, 1 }
 0x152   :  { %v1498_v43 = vrot.slane %v1465_v17, 5  ;;  %v1497_v51 = vsel %vm1202_vm2, %v1496_v34, %v1495_v14  ;;  %v1500_v21 = vrot.slane %v1466_v45, 4 }
 0x153   :  { %v1502_v3 = vrot.slane %v1467_v6, 3  ;;  %v1504_v47 = vrot.slane %v1468_v4, 2 }
 0x154   :  { %v1499_v50 = vsel %vm1204_vm3, %v1498_v43, %v1497_v51 }
 0x155   :  { %v1501_v0 = vsel %vm1206_vm4, %v1500_v21, %v1499_v50 }
 0x156   :  { %v1503_v19 = vsel %vm1208_vm5, %v1502_v3, %v1501_v0 }
 0x157   :  { %v1505_v8 = vsel %vm1210_vm6, %v1504_v47, %v1503_v19 }
 0x158   :  { %v1507_v61 = vsel %vm2800_vm12, %v1506_v27, %v1505_v8 }
 0x159   :  { %1524 = vst.msk [vmem:[%s2793_s8] sm:$0xff] %vm623_vm0, %v1507_v61 }
 0x15a   :  { %1530 = vsyncpa [#allocation3], 1 }

</bundles_post_ra>
